<compile_context>
chip_gen: v5e
topology: v5e:2x2
jax: 0.10.0
libtpu: 0.0.40
codegen_flags: <defaults>
</compile_context>

<pallas_src>
import jax
import jax.numpy as jnp
from jax.experimental import pallas as pl
from jax.experimental.pallas import tpu as pltpu

LANE = 128


def _ceil_to(x, m):
    return ((x + m - 1) // m) * m


def _pick_vmem_limit():
    """Generation-aware VMEM request: <=40 MiB on 64-MiB parts (v7x),
    64 MiB on 128-MiB parts (v5e/v6e)."""
    cap = 128 * 1024 * 1024
    try:
        info = pltpu.get_tpu_info()
        for attr in ("vmem_capacity_bytes", "vmem_size_bytes", "vmem_bytes"):
            v = getattr(info, attr, None)
            if v:
                cap = int(v)
                break
    except Exception:
        pass
    return 40 * 1024 * 1024 if cap <= 64 * 1024 * 1024 else 64 * 1024 * 1024


# --------------------------------------------------------------------------
# Pallas kernel
# --------------------------------------------------------------------------
def bottleneck_kernel(x_ref, w1_ref, b1_ref, w2_ref, b2_ref, w3_ref, b3_ref,
                      o_ref):
    # x_ref : (1, H+2, W, Cin)  bf16 — whole image, one zero row top & bottom.
    # o_ref : (1, R,   W, Cout) bf16 — one row-block of the output.
    _, _, W, Cin = x_ref.shape
    _, R, _, Cout = o_ref.shape
    P = b1_ref.shape[1]
    RW = R * W
    RW2 = (R + 2) * W

    r = pl.program_id(1)
    n_r = pl.num_programs(1)
    row0 = pl.multiple_of(r * R, R)          # top padded-row of the halo window

    # ---- conv1 (1x1, BN folded) + bias + ReLU on R+2 halo rows -----------
    xw = x_ref[0, pl.ds(row0, R + 2)].reshape(RW2, Cin)          # bf16
    h1 = jnp.dot(xw, w1_ref[...], preferred_element_type=jnp.float32)
    h1 = jnp.maximum(h1 + b1_ref[...], 0.0)                      # f32 (RW2, P)

    # Zero the halo rows that fall on the image border: conv1 of the zero pad
    # rows is relu(bias), but conv2's SAME padding needs zeros there.
    widx = jax.lax.broadcasted_iota(jnp.int32, (RW2, P), 0)
    keep = jnp.logical_and(
        jnp.logical_or(r > 0, widx >= W),
        jnp.logical_or(r < n_r - 1, widx < (R + 1) * W))
    h1 = jnp.where(keep, h1, 0.0)                                # f32 (RW2, P)

    # ---- conv2 (3x3, pad 1): three accumulated K = 3P matmuls ------------
    # Column-validity masks for the dx = +/-1 taps, built in-kernel (VPU).
    col = jax.lax.broadcasted_iota(jnp.int32, (R, W, P), 1).reshape(RW, P)
    left_ok = (col >= 1).astype(jnp.float32)        # dx = -1 needs w-1 >= 0
    right_ok = (col <= W - 2).astype(jnp.float32)   # dx = +1 needs w+1 <  W

    acc = None
    for g, dy in enumerate((-1, 0, 1)):
        base = (1 + dy) * W                          # static, tile-aligned
        slab = h1[base:base + RW]                    # f32 (RW, P)
        taps = []
        for dx in (-1, 0, 1):
            if dx == 0:
                t = slab
            else:
                # XLU roll overlaps the MXU dot of the previous group.
                t = pltpu.roll(slab, (-dx) % RW, axis=0)
                t = t * (left_ok if dx == -1 else right_ok)
            taps.append(t.astype(jnp.bfloat16))
        im2col = jnp.concatenate(taps, axis=1)       # bf16 (RW, 3P)
        part = jnp.dot(im2col, w2_ref[g], preferred_element_type=jnp.float32)
        acc = part if acc is None else acc + part

    h2 = jnp.maximum(acc + b2_ref[...], 0.0)         # f32 (RW, P)

    # ---- conv3 (1x1) + bias + residual + ReLU -----------------------------
    h3 = jnp.dot(h2.astype(jnp.bfloat16), w3_ref[...],
                 preferred_element_type=jnp.float32)
    # Residual read late (short live range); Cin == Cout.
    res = x_ref[0, pl.ds(row0 + 1, R)].reshape(RW, Cout).astype(jnp.float32)
    out = jnp.maximum(h3 + b3_ref[...] + res, 0.0)
    o_ref[...] = out.reshape(1, R, W, Cout).astype(o_ref.dtype)


# --------------------------------------------------------------------------
# pallas_call wrapper
# --------------------------------------------------------------------------
def bottleneck_pallas(x_rows, w1, b1, w2, b2, w3, b3, *, row_block=8):
    N, Hp2, W, Cin = x_rows.shape
    H = Hp2 - 2
    Cout = w3.shape[1]
    R = min(row_block, H)
    assert H % R == 0, "row_block must divide H"
    assert W % 8 == 0, "kernel assumes W is a multiple of the 8-sublane tile"
    assert Cin == Cout, "identity residual requires inplanes == planes * 4"
    n_r = H // R

    def const_spec(a):
        zeros = (0,) * a.ndim
        return pl.BlockSpec(a.shape, lambda n, r, z=zeros: z)

    return pl.pallas_call(
        bottleneck_kernel,
        out_shape=jax.ShapeDtypeStruct((N, H, W, Cout), jnp.bfloat16),
        grid_spec=pltpu.PrefetchScalarGridSpec(
            num_scalar_prefetch=0,
            grid=(N, n_r),
            in_specs=[
                # whole (row-padded) image resident across the row-block axis
                pl.BlockSpec((1, Hp2, W, Cin), lambda n, r: (n, 0, 0, 0)),
                const_spec(w1), const_spec(b1),
                const_spec(w2), const_spec(b2),
                const_spec(w3), const_spec(b3),
            ],
            out_specs=pl.BlockSpec((1, R, W, Cout), lambda n, r: (n, r, 0, 0)),
        ),
        compiler_params=pltpu.CompilerParams(
            dimension_semantics=("parallel", "parallel"),
            vmem_limit_bytes=_pick_vmem_limit(),
        ),
    )(x_rows, w1, b1, w2, b2, w3, b3)


# --------------------------------------------------------------------------
# Host-side parameter / input preparation (BN fold, padding, bf16 cast)
# --------------------------------------------------------------------------
def fold_bn(gamma, beta, mean, var, eps=1e-5):
    scale = gamma / jnp.sqrt(var + eps)
    bias = beta - mean * scale
    return scale, bias


def prepare_params(w1_oihw, bn1, w2_oihw, bn2, w3_oihw, bn3, eps=1e-5):
    P, Cin = w1_oihw.shape[:2]
    Cout = w3_oihw.shape[0]
    Cin_p, P_p, Cout_p = (_ceil_to(c, LANE) for c in (Cin, P, Cout))

    s1, c1 = fold_bn(*bn1, eps)
    s2, c2 = fold_bn(*bn2, eps)
    s3, c3 = fold_bn(*bn3, eps)

    # conv1: OIHW (P, Cin, 1, 1) -> (Cin, P); BN scale folded per out-channel.
    w1 = jnp.transpose(w1_oihw[:, :, 0, 0], (1, 0)) * s1[None, :]
    w1p = jnp.zeros((Cin_p, P_p), jnp.float32).at[:Cin, :P].set(w1)
    b1 = jnp.zeros((1, P_p), jnp.float32).at[0, :P].set(c1)

    # conv2: OIHW -> HWIO (ky, kx, in, out); fold; pad; group by ky (= dy row):
    # (3, 3*P_p, P_p) where row index inside a group = kx*P_p + cin, matching
    # the kernel's per-group dx tap concatenation order.
    w2_hwio = jnp.transpose(w2_oihw, (2, 3, 1, 0)) * s2[None, None, None, :]
    w2_hwio_p = (jnp.zeros((3, 3, P_p, P_p), jnp.float32)
                 .at[:, :, :P, :P].set(w2_hwio))
    w2p = w2_hwio_p.reshape(3, 3 * P_p, P_p)
    b2 = jnp.zeros((1, P_p), jnp.float32).at[0, :P].set(c2)

    # conv3: OIHW (Cout, P, 1, 1) -> (P, Cout)
    w3 = jnp.transpose(w3_oihw[:, :, 0, 0], (1, 0)) * s3[None, :]
    w3p = jnp.zeros((P_p, Cout_p), jnp.float32).at[:P, :Cout].set(w3)
    b3 = jnp.zeros((1, Cout_p), jnp.float32).at[0, :Cout].set(c3)

    bf16 = jnp.bfloat16
    return dict(
        w1=w1p.astype(bf16), b1=b1,
        w2=w2p.astype(bf16), b2=b2,
        w3=w3p.astype(bf16), b3=b3,
        w2_hwio=w2_hwio_p.astype(bf16),      # for the reference conv
        dims=(Cin_p, P_p, Cout_p),
        raw_dims=(Cin, P, Cout),
    )


def prepare_input(x_nchw, c_pad):
    """NCHW f32 -> NHWC bf16, channels padded to c_pad, one zero row at the
    top and bottom of H (halo rows for the row-block windows)."""
    N, C, H, W = x_nchw.shape
    x_nhwc = jnp.transpose(x_nchw, (0, 2, 3, 1)).astype(jnp.bfloat16)
    x = jnp.zeros((N, H + 2, W, c_pad), jnp.bfloat16)
    return x.at[:, 1:H + 1, :, :C].set(x_nhwc)


# --------------------------------------------------------------------------
# References
# --------------------------------------------------------------------------
def reference_bf16(x_nhwc_pad, prep):
    """NHWC reference with the same bf16 rounding points as the kernel."""
    f32 = jnp.float32
    x = x_nhwc_pad.astype(f32)
    h1 = jnp.maximum(
        jnp.einsum("nhwc,cp->nhwp", x, prep["w1"].astype(f32)) + prep["b1"],
        0.0)
    h1 = h1.astype(jnp.bfloat16).astype(f32)
    h2 = jax.lax.conv_general_dilated(
        h1, prep["w2_hwio"].astype(f32), (1, 1), "SAME",
        dimension_numbers=("NHWC", "HWIO", "NHWC"))
    h2 = jnp.maximum(h2 + prep["b2"], 0.0).astype(jnp.bfloat16).astype(f32)
    h3 = jnp.einsum("nhwp,pc->nhwc", h2, prep["w3"].astype(f32)) + prep["b3"]
    return jnp.maximum(h3 + x, 0.0)


def reference_torch(x_nchw, w1_oihw, bn1, w2_oihw, bn2, w3_oihw, bn3, eps=1e-5):
    """Straightforward f32 NCHW reference mirroring the PyTorch module."""
    def bn(h, p):
        g, b, m, v = p
        inv = g / jnp.sqrt(v + eps)
        return h * inv[None, :, None, None] + (b - m * inv)[None, :, None, None]

    def conv(h, w, pad):
        return jax.lax.conv_general_dilated(
            h, w, (1, 1), pad, dimension_numbers=("NCHW", "OIHW", "NCHW"))

    h = jnp.maximum(bn(conv(x_nchw, w1_oihw, "VALID"), bn1), 0.0)
    h = jnp.maximum(bn(conv(h, w2_oihw, "SAME"), bn2), 0.0)
    h = bn(conv(h, w3_oihw, "VALID"), bn3)
    return jnp.maximum(h + x_nchw, 0.0)


# --------------------------------------------------------------------------
if __name__ == "__main__":
    key = jax.random.PRNGKey(0)
    N, H, W = 2, 16, 16
    planes = 4
    inplanes = planes * 4          # downsample=None requires inplanes == planes*4
    Cout = planes * 4

    ks = jax.random.split(key, 7)

    # PyTorch-layout parameters (OIHW weights), deterministic init.
    w1_t = jax.random.normal(ks[0], (planes, inplanes, 1, 1), jnp.float32) * 0.1
    w2_t = jax.random.normal(ks[1], (planes, planes, 3, 3), jnp.float32) * 0.1
    w3_t = jax.random.normal(ks[2], (Cout, planes, 1, 1), jnp.float32) * 0.1

    def bn_params(k, c):
        k1, k2, k3, k4 = jax.random.split(k, 4)
        gamma = jax.random.uniform(k1, (c,), jnp.float32, 0.5, 1.5)
        beta = jax.random.normal(k2, (c,), jnp.float32) * 0.1
        mean = jax.random.normal(k3, (c,), jnp.float32) * 0.1
        var = jax.random.uniform(k4, (c,), jnp.float32, 0.5, 1.5)
        return gamma, beta, mean, var

    bn1 = bn_params(ks[3], planes)
    bn2 = bn_params(ks[4], planes)
    bn3 = bn_params(ks[5], Cout)

    # Input in PyTorch NCHW convention.
    x_nchw = jax.random.normal(ks[6], (N, inplanes, H, W), jnp.float32)

    prep = prepare_params(w1_t, bn1, w2_t, bn2, w3_t, bn3)
    Cin_p, P_p, Cout_p = prep["dims"]

    # ---- run the fused Pallas kernel -----------------------------------
    x_rows = prepare_input(x_nchw, Cin_p)            # (N, H+2, W, Cin_p) bf16
    out_pad = jax.block_until_ready(
        bottleneck_pallas(x_rows, prep["w1"], prep["b1"], prep["w2"],
                          prep["b2"], prep["w3"], prep["b3"], row_block=8))

    # ---- check 1: precision-matched reference (same bf16 rounding) -----
    x_nhwc_pad = x_rows[:, 1:H + 1]                  # drop the halo rows
    ref_tight = reference_bf16(x_nhwc_pad, prep).astype(jnp.bfloat16)
    assert out_pad.shape == (N, H, W, Cout_p)
    assert out_pad.dtype == jnp.bfloat16
    assert jnp.allclose(out_pad.astype(jnp.float32),
                        ref_tight.astype(jnp.float32),
                        atol=3e-2, rtol=3e-2), \
        "mismatch vs precision-matched reference"

    # ---- check 2: module-level f32 reference on raw (unfolded) params --
    out_nchw = jnp.transpose(out_pad[..., :Cout].astype(jnp.float32),
                             (0, 3, 1, 2))
    ref_module = reference_torch(x_nchw, w1_t, bn1, w2_t, bn2, w3_t, bn3)
    assert out_nchw.shape == (N, Cout, H, W)
    assert jnp.allclose(out_nchw, ref_module, atol=6e-2, rtol=6e-2), \
        "mismatch vs module-level f32 reference"

    print("KERNEL_OK")
</pallas_src>

<mosaic_0001>
module attributes {stable_mosaic.version = 11 : i64} {
  func.func @bottleneck_kernel(%arg0: i32, %arg1: i32, %arg2: memref<1x18x16x128xbf16, #tpu.memory_space<vmem>>, %arg3: memref<128x128xbf16, #tpu.memory_space<vmem>>, %arg4: memref<1x128xf32, #tpu.memory_space<vmem>>, %arg5: memref<3x384x128xbf16, #tpu.memory_space<vmem>>, %arg6: memref<1x128xf32, #tpu.memory_space<vmem>>, %arg7: memref<128x128xbf16, #tpu.memory_space<vmem>>, %arg8: memref<1x128xf32, #tpu.memory_space<vmem>>, %arg9: memref<1x8x16x128xbf16, #tpu.memory_space<vmem>>) attributes {dimension_semantics = [#tpu.dimension_semantics<parallel>, #tpu.dimension_semantics<parallel>], iteration_bounds = array<i64: 2, 2>, scalar_prefetch = 0 : i64, scratch_operands = 0 : i64, tpu.core_type = #tpu.core_type<tc>, window_params = [{transform_indices = @transform_0, window_bounds = array<i64: 1, 18, 16, 128>}, {pipeline_mode = #tpu.pipeline_mode<synchronous>, transform_indices = @transform_1, window_bounds = array<i64: 128, 128>}, {pipeline_mode = #tpu.pipeline_mode<synchronous>, transform_indices = @transform_2, window_bounds = array<i64: 1, 128>}, {pipeline_mode = #tpu.pipeline_mode<synchronous>, transform_indices = @transform_3, window_bounds = array<i64: 3, 384, 128>}, {pipeline_mode = #tpu.pipeline_mode<synchronous>, transform_indices = @transform_4, window_bounds = array<i64: 1, 128>}, {pipeline_mode = #tpu.pipeline_mode<synchronous>, transform_indices = @transform_5, window_bounds = array<i64: 128, 128>}, {pipeline_mode = #tpu.pipeline_mode<synchronous>, transform_indices = @transform_6, window_bounds = array<i64: 1, 128>}, {transform_indices = @transform_7, window_bounds = array<i64: 1, 8, 16, 128>}]} {
    %c8_i32 = arith.constant 8 : i32
    %0 = arith.muli %arg1, %c8_i32 : i32
    %1 = tpu.assume_multiple %0, 8 : i32
    %c0 = arith.constant 0 : index
    %2 = arith.index_cast %1 : i32 to index
    %c0_0 = arith.constant 0 : index
    %c0_1 = arith.constant 0 : index
    %3 = vector.load %arg2[%c0, %2, %c0_0, %c0_1] : memref<1x18x16x128xbf16, #tpu.memory_space<vmem>>, vector<1x10x16x128xbf16>
    %4 = vector.shape_cast %3 : vector<1x10x16x128xbf16> to vector<10x16x128xbf16>
    %5 = vector.shape_cast %4 : vector<10x16x128xbf16> to vector<160x128xbf16>
    %c0_2 = arith.constant 0 : index
    %c0_3 = arith.constant 0 : index
    %6 = vector.load %arg3[%c0_2, %c0_3] : memref<128x128xbf16, #tpu.memory_space<vmem>>, vector<128x128xbf16>
    %cst = arith.constant dense<0.000000e+00> : vector<160x128xf32>
    %7 = tpu.matmul %5, %6, %cst {dimension_numbers = #tpu.dot_dimension_numbers<[1], [0], [0], [1], [0, 0, 1, 1], [], []>} : vector<160x128xbf16>, vector<128x128xbf16>, vector<160x128xf32> -> vector<160x128xf32>
    %c0_4 = arith.constant 0 : index
    %c0_5 = arith.constant 0 : index
    %8 = vector.load %arg4[%c0_4, %c0_5] : memref<1x128xf32, #tpu.memory_space<vmem>>, vector<1x128xf32>
    %9 = vector.broadcast %8 : vector<1x128xf32> to vector<160x128xf32>
    %10 = arith.addf %7, %9 : vector<160x128xf32>
    %cst_6 = arith.constant 0.000000e+00 : f32
    %11 = vector.broadcast %cst_6 : f32 to vector<160x128xf32>
    %12 = arith.maximumf %10, %11 : vector<160x128xf32>
    %13 = tpu.iota {dimensions = array<i32: 0>} : vector<160x128xi32>
    %c0_i32 = arith.constant 0 : i32
    %14 = arith.cmpi sgt, %arg1, %c0_i32 : i32
    %c16_i32 = arith.constant 16 : i32
    %15 = vector.broadcast %c16_i32 : i32 to vector<160x128xi32>
    %16 = arith.cmpi sge, %13, %15 : vector<160x128xi32>
    %17 = vector.broadcast %14 : i1 to vector<160x128xi1>
    %18 = arith.ori %17, %16 : vector<160x128xi1>
    %c1_i32 = arith.constant 1 : i32
    %19 = arith.cmpi slt, %arg1, %c1_i32 : i32
    %c144_i32 = arith.constant 144 : i32
    %20 = vector.broadcast %c144_i32 : i32 to vector<160x128xi32>
    %21 = arith.cmpi slt, %13, %20 : vector<160x128xi32>
    %22 = vector.broadcast %19 : i1 to vector<160x128xi1>
    %23 = arith.ori %22, %21 : vector<160x128xi1>
    %24 = arith.andi %18, %23 : vector<160x128xi1>
    %cst_7 = arith.constant 0.000000e+00 : f32
    %25 = vector.broadcast %cst_7 : f32 to vector<160x128xf32>
    %26 = arith.select %24, %12, %25 : vector<160x128xi1>, vector<160x128xf32>
    %27 = tpu.iota {dimensions = array<i32: 1>} : vector<8x16x128xi32>
    %28 = vector.shape_cast %27 : vector<8x16x128xi32> to vector<128x128xi32>
    %c1_i32_8 = arith.constant 1 : i32
    %29 = vector.broadcast %c1_i32_8 : i32 to vector<128x128xi32>
    %30 = arith.cmpi sge, %28, %29 : vector<128x128xi32>
    %31 = arith.extui %30 : vector<128x128xi1> to vector<128x128xi32>
    %32 = arith.sitofp %31 : vector<128x128xi32> to vector<128x128xf32>
    %c14_i32 = arith.constant 14 : i32
    %33 = vector.broadcast %c14_i32 : i32 to vector<128x128xi32>
    %34 = arith.cmpi sle, %28, %33 : vector<128x128xi32>
    %35 = arith.extui %34 : vector<128x128xi1> to vector<128x128xi32>
    %36 = arith.sitofp %35 : vector<128x128xi32> to vector<128x128xf32>
    %37 = vector.extract_strided_slice %26 {offsets = [0, 0], sizes = [128, 128], strides = [1, 1]} : vector<160x128xf32> to vector<128x128xf32>
    %c1_i32_9 = arith.constant 1 : i32
    %38 = tpu.dynamic_rotate %37 by %c1_i32_9 dim 0 : vector<128x128xf32>, i32 -> vector<128x128xf32>
    %39 = arith.mulf %38, %32 : vector<128x128xf32>
    %40 = arith.truncf %39 : vector<128x128xf32> to vector<128x128xbf16>
    %41 = arith.truncf %37 : vector<128x128xf32> to vector<128x128xbf16>
    %c127_i32 = arith.constant 127 : i32
    %42 = tpu.dynamic_rotate %37 by %c127_i32 dim 0 : vector<128x128xf32>, i32 -> vector<128x128xf32>
    %43 = arith.mulf %42, %36 : vector<128x128xf32>
    %44 = arith.truncf %43 : vector<128x128xf32> to vector<128x128xbf16>
    %45 = tpu.concatenate %40, %41, %44 in 1 : vector<128x128xbf16>, vector<128x128xbf16>, vector<128x128xbf16> -> vector<128x384xbf16>
    %c0_10 = arith.constant 0 : index
    %c0_11 = arith.constant 0 : index
    %c0_12 = arith.constant 0 : index
    %46 = vector.load %arg5[%c0_10, %c0_11, %c0_12] : memref<3x384x128xbf16, #tpu.memory_space<vmem>>, vector<1x384x128xbf16>
    %47 = vector.shape_cast %46 : vector<1x384x128xbf16> to vector<384x128xbf16>
    %cst_13 = arith.constant dense<0.000000e+00> : vector<128x128xf32>
    %48 = tpu.matmul %45, %47, %cst_13 {dimension_numbers = #tpu.dot_dimension_numbers<[1], [0], [0], [1], [0, 0, 1, 1], [], []>} : vector<128x384xbf16>, vector<384x128xbf16>, vector<128x128xf32> -> vector<128x128xf32>
    %49 = vector.extract_strided_slice %26 {offsets = [16, 0], sizes = [128, 128], strides = [1, 1]} : vector<160x128xf32> to vector<128x128xf32>
    %c1_i32_14 = arith.constant 1 : i32
    %50 = tpu.dynamic_rotate %49 by %c1_i32_14 dim 0 : vector<128x128xf32>, i32 -> vector<128x128xf32>
    %51 = arith.mulf %50, %32 : vector<128x128xf32>
    %52 = arith.truncf %51 : vector<128x128xf32> to vector<128x128xbf16>
    %53 = arith.truncf %49 : vector<128x128xf32> to vector<128x128xbf16>
    %c127_i32_15 = arith.constant 127 : i32
    %54 = tpu.dynamic_rotate %49 by %c127_i32_15 dim 0 : vector<128x128xf32>, i32 -> vector<128x128xf32>
    %55 = arith.mulf %54, %36 : vector<128x128xf32>
    %56 = arith.truncf %55 : vector<128x128xf32> to vector<128x128xbf16>
    %57 = tpu.concatenate %52, %53, %56 in 1 : vector<128x128xbf16>, vector<128x128xbf16>, vector<128x128xbf16> -> vector<128x384xbf16>
    %c1 = arith.constant 1 : index
    %c0_16 = arith.constant 0 : index
    %c0_17 = arith.constant 0 : index
    %58 = vector.load %arg5[%c1, %c0_16, %c0_17] : memref<3x384x128xbf16, #tpu.memory_space<vmem>>, vector<1x384x128xbf16>
    %59 = vector.shape_cast %58 : vector<1x384x128xbf16> to vector<384x128xbf16>
    %cst_18 = arith.constant dense<0.000000e+00> : vector<128x128xf32>
    %60 = tpu.matmul %57, %59, %cst_18 {dimension_numbers = #tpu.dot_dimension_numbers<[1], [0], [0], [1], [0, 0, 1, 1], [], []>} : vector<128x384xbf16>, vector<384x128xbf16>, vector<128x128xf32> -> vector<128x128xf32>
    %61 = arith.addf %48, %60 : vector<128x128xf32>
    %62 = vector.extract_strided_slice %26 {offsets = [32, 0], sizes = [128, 128], strides = [1, 1]} : vector<160x128xf32> to vector<128x128xf32>
    %c1_i32_19 = arith.constant 1 : i32
    %63 = tpu.dynamic_rotate %62 by %c1_i32_19 dim 0 : vector<128x128xf32>, i32 -> vector<128x128xf32>
    %64 = arith.mulf %63, %32 : vector<128x128xf32>
    %65 = arith.truncf %64 : vector<128x128xf32> to vector<128x128xbf16>
    %66 = arith.truncf %62 : vector<128x128xf32> to vector<128x128xbf16>
    %c127_i32_20 = arith.constant 127 : i32
    %67 = tpu.dynamic_rotate %62 by %c127_i32_20 dim 0 : vector<128x128xf32>, i32 -> vector<128x128xf32>
    %68 = arith.mulf %67, %36 : vector<128x128xf32>
    %69 = arith.truncf %68 : vector<128x128xf32> to vector<128x128xbf16>
    %70 = tpu.concatenate %65, %66, %69 in 1 : vector<128x128xbf16>, vector<128x128xbf16>, vector<128x128xbf16> -> vector<128x384xbf16>
    %c2 = arith.constant 2 : index
    %c0_21 = arith.constant 0 : index
    %c0_22 = arith.constant 0 : index
    %71 = vector.load %arg5[%c2, %c0_21, %c0_22] : memref<3x384x128xbf16, #tpu.memory_space<vmem>>, vector<1x384x128xbf16>
    %72 = vector.shape_cast %71 : vector<1x384x128xbf16> to vector<384x128xbf16>
    %cst_23 = arith.constant dense<0.000000e+00> : vector<128x128xf32>
    %73 = tpu.matmul %70, %72, %cst_23 {dimension_numbers = #tpu.dot_dimension_numbers<[1], [0], [0], [1], [0, 0, 1, 1], [], []>} : vector<128x384xbf16>, vector<384x128xbf16>, vector<128x128xf32> -> vector<128x128xf32>
    %74 = arith.addf %61, %73 : vector<128x128xf32>
    %c0_24 = arith.constant 0 : index
    %c0_25 = arith.constant 0 : index
    %75 = vector.load %arg6[%c0_24, %c0_25] : memref<1x128xf32, #tpu.memory_space<vmem>>, vector<1x128xf32>
    %76 = vector.broadcast %75 : vector<1x128xf32> to vector<128x128xf32>
    %77 = arith.addf %74, %76 : vector<128x128xf32>
    %cst_26 = arith.constant 0.000000e+00 : f32
    %78 = vector.broadcast %cst_26 : f32 to vector<128x128xf32>
    %79 = arith.maximumf %77, %78 : vector<128x128xf32>
    %80 = arith.truncf %79 : vector<128x128xf32> to vector<128x128xbf16>
    %c0_27 = arith.constant 0 : index
    %c0_28 = arith.constant 0 : index
    %81 = vector.load %arg7[%c0_27, %c0_28] : memref<128x128xbf16, #tpu.memory_space<vmem>>, vector<128x128xbf16>
    %cst_29 = arith.constant dense<0.000000e+00> : vector<128x128xf32>
    %82 = tpu.matmul %80, %81, %cst_29 {dimension_numbers = #tpu.dot_dimension_numbers<[1], [0], [0], [1], [0, 0, 1, 1], [], []>} : vector<128x128xbf16>, vector<128x128xbf16>, vector<128x128xf32> -> vector<128x128xf32>
    %c1_i32_30 = arith.constant 1 : i32
    %83 = arith.addi %1, %c1_i32_30 : i32
    %c0_31 = arith.constant 0 : index
    %84 = arith.index_cast %83 : i32 to index
    %c0_32 = arith.constant 0 : index
    %c0_33 = arith.constant 0 : index
    %85 = vector.load %arg2[%c0_31, %84, %c0_32, %c0_33] : memref<1x18x16x128xbf16, #tpu.memory_space<vmem>>, vector<1x8x16x128xbf16>
    %86 = vector.shape_cast %85 : vector<1x8x16x128xbf16> to vector<8x16x128xbf16>
    %87 = vector.shape_cast %86 : vector<8x16x128xbf16> to vector<128x128xbf16>
    %88 = arith.extf %87 : vector<128x128xbf16> to vector<128x128xf32>
    %c0_34 = arith.constant 0 : index
    %c0_35 = arith.constant 0 : index
    %89 = vector.load %arg8[%c0_34, %c0_35] : memref<1x128xf32, #tpu.memory_space<vmem>>, vector<1x128xf32>
    %90 = vector.broadcast %89 : vector<1x128xf32> to vector<128x128xf32>
    %91 = arith.addf %82, %90 : vector<128x128xf32>
    %92 = arith.addf %91, %88 : vector<128x128xf32>
    %cst_36 = arith.constant 0.000000e+00 : f32
    %93 = vector.broadcast %cst_36 : f32 to vector<128x128xf32>
    %94 = arith.maximumf %92, %93 : vector<128x128xf32>
    %95 = vector.shape_cast %94 : vector<128x128xf32> to vector<1x8x16x128xf32>
    %96 = arith.truncf %95 : vector<1x8x16x128xf32> to vector<1x8x16x128xbf16>
    %c0_37 = arith.constant 0 : index
    %c0_38 = arith.constant 0 : index
    %c0_39 = arith.constant 0 : index
    %c0_40 = arith.constant 0 : index
    %97 = vector.load %arg9[%c0_37, %c0_38, %c0_39, %c0_40] : memref<1x8x16x128xbf16, #tpu.memory_space<vmem>>, vector<1x8x16x128xbf16>
    tpu.vector_store %arg9[%c0_37, %c0_38, %c0_39, %c0_40], %96 {strides = array<i32>} : memref<1x8x16x128xbf16, #tpu.memory_space<vmem>>, vector<1x8x16x128xbf16>,
    return
  }
  func.func @transform_0(%arg0: i32, %arg1: i32) -> (i32, i32, i32, i32) {
    %c0_i32 = arith.constant 0 : i32
    %c0_i32_0 = arith.constant 0 : i32
    %c0_i32_1 = arith.constant 0 : i32
    %c0_i32_2 = arith.constant 0 : i32
    return %arg0, %c0_i32, %c0_i32_0, %c0_i32_1 : i32, i32, i32, i32
  }
  func.func @transform_1(%arg0: i32, %arg1: i32) -> (i32, i32) {
    %c0_i32 = arith.constant 0 : i32
    %c0_i32_0 = arith.constant 0 : i32
    %c0_i32_1 = arith.constant 0 : i32
    return %c0_i32, %c0_i32_0 : i32, i32
  }
  func.func @transform_2(%arg0: i32, %arg1: i32) -> (i32, i32) {
    %c0_i32 = arith.constant 0 : i32
    %c0_i32_0 = arith.constant 0 : i32
    %c0_i32_1 = arith.constant 0 : i32
    return %c0_i32, %c0_i32_0 : i32, i32
  }
  func.func @transform_3(%arg0: i32, %arg1: i32) -> (i32, i32, i32) {
    %c0_i32 = arith.constant 0 : i32
    %c0_i32_0 = arith.constant 0 : i32
    %c0_i32_1 = arith.constant 0 : i32
    %c0_i32_2 = arith.constant 0 : i32
    return %c0_i32, %c0_i32_0, %c0_i32_1 : i32, i32, i32
  }
  func.func @transform_4(%arg0: i32, %arg1: i32) -> (i32, i32) {
    %c0_i32 = arith.constant 0 : i32
    %c0_i32_0 = arith.constant 0 : i32
    %c0_i32_1 = arith.constant 0 : i32
    return %c0_i32, %c0_i32_0 : i32, i32
  }
  func.func @transform_5(%arg0: i32, %arg1: i32) -> (i32, i32) {
    %c0_i32 = arith.constant 0 : i32
    %c0_i32_0 = arith.constant 0 : i32
    %c0_i32_1 = arith.constant 0 : i32
    return %c0_i32, %c0_i32_0 : i32, i32
  }
  func.func @transform_6(%arg0: i32, %arg1: i32) -> (i32, i32) {
    %c0_i32 = arith.constant 0 : i32
    %c0_i32_0 = arith.constant 0 : i32
    %c0_i32_1 = arith.constant 0 : i32
    return %c0_i32, %c0_i32_0 : i32, i32
  }
  func.func @transform_7(%arg0: i32, %arg1: i32) -> (i32, i32, i32, i32) {
    %c0_i32 = arith.constant 0 : i32
    %c0_i32_0 = arith.constant 0 : i32
    %c0_i32_1 = arith.constant 0 : i32
    return %arg0, %arg1, %c0_i32, %c0_i32_0 : i32, i32, i32, i32
  }
}

</mosaic_0001>

<bundles_post_ra>
// kernel: tpu_custom_call.1
= control target key start
LH: loop header
LB: loop body
LE: loop exit
PB: predicated region body
PF: predicated region fallthrough
CT: control target
= control target key end

     0   :  { %s4673_s0 = inlined_call_operand.hbm [shape: bf16[2,18,16,128], index: 0, kind: input, shape index: {}]   ;;  %s4674_s1 = inlined_call_operand.hbm [shape: bf16[128,128], index: 1, kind: input, shape index: {}]   ;;  %s4675_s2 = inlined_call_operand.vmem [shape: f32[1,128], index: 2, kind: input, shape index: {}]   ;;  %s4676_s3 = inlined_call_operand.hbm [shape: bf16[3,384,128], index: 3, kind: input, shape index: {}]   ;;  %s4677_s4 = inlined_call_operand.vmem [shape: f32[1,128], index: 4, kind: input, shape index: {}]   ;;  %s4678_s5 = inlined_call_operand.hbm [shape: bf16[128,128], index: 5, kind: input, shape index: {}]   ;;  %s4679_s6 = inlined_call_operand.vmem [shape: f32[1,128], index: 6, kind: input, shape index: {}]   ;;  %s4680_s7 = inlined_call_operand.hbm [shape: bf16[2,16,16,128], index: 7, kind: output, shape index: {}]  }
   0x1   :  { %4696 = sst [smem:[#allocation50_spill]] %s4674_s1 }
   0x2   :  { %4697 = sst [smem:[#allocation51_spill]] %s4676_s3 }
   0x3   :  { %4698 = sst [smem:[#allocation52_spill]] %s4678_s5 }
   0x4   :  { %4699 = sst [smem:[#allocation53_spill]] %s4680_s7 }
   0x5   :  { %12 = vsyncpa [#allocation3], 0 }
   0x6   :  { %14 = vsyncpa [#allocation3 + $0x1], 0 }
   0x7   :  { %15 = vsyncpa [#allocation6], 0 }
   0x8   :  { %16 = vsyncpa [#allocation9], 0 }
   0x9   :  { %17 = vsyncpa [#allocation4], 0 }
   0xa   :  { %19 = vsyncpa [#allocation4 + $0x1], 0  ;;  %s3675_s24 = smov 0   ;;  %s3677_s25 = smov 0  }
   0xb   :  { %s3679_s26 = smov 0   ;;  %s3681_s27 = smov 0  }
   0xc   :  { %s3683_s28 = smov 0   ;;  %s3685_s29 = smov 0  }
   0xd   :  { %s3687_s30 = smov 0   ;;  %s3689_s8 = smov 0  }
   0xe   :  { %s3691_s9 = smov 0   ;;  %s3693_s10 = smov 0  }
   0xf   :  { %s3695_s11 = smov 0  }
  0x10 LB: > { %4700 = sst [smem:[#allocation15_spill]] %s3585_s24  ;;  %s2583_s12 = sadd.s32 4294967295, %s3625_s11   ;;  %s3625_s11 = sphi %s3695_s11, %s25_s11   ;;  %s3621_s10 = sphi %s3693_s10, %s4792_s10   ;;  %s3617_s9 = sphi %s3691_s9, %s4791_s9   ;;  %s3613_s8 = sphi %s3689_s8, %s4790_s8   ;;  %s3609_s30 = sphi %s3687_s30, %s4789_s30   ;;  %s3605_s29 = sphi %s3685_s29, %s4797_s29   ;;  %s3601_s28 = sphi %s3683_s28, %s4796_s28   ;;  %s3597_s27 = sphi %s3681_s27, %s4795_s27   ;;  %s3593_s26 = sphi %s3679_s26, %s4794_s26   ;;  %s3589_s25 = sphi %s3677_s25, %s4793_s25   ;;  %s3585_s24 = sphi %s3675_s24, %s4788_s24  }
  0x11   : > { %4701 = sst [smem:[#allocation16_spill]] %s3589_s25  ;;  %s2584_s13 = sadd.s32 4294967294, %s3625_s11  }
  0x12   : > { %4702 = sst [smem:[#allocation17_spill]] %s3613_s8  ;;  %p57_p0 = scmp.ne.s32.totalorder %s3601_s28, %s3597_s27 }
  0x13   : > { %4703 = sst [smem:[#allocation18_spill]] %s3617_s9  ;;  %p3731_p1 = scmp.eq.s32.totalorder %s2583_s12, 0 }
  0x14   : > { %4704 = sst [smem:[#allocation19_spill]] %s3621_s10  ;;  %p208_p2 = scmp.ne.s32.totalorder %s3593_s26, %s3589_s25 }
  0x15   : > { %p209_p3 = scmp.eq.s32.totalorder %s2583_s12, 3  ;;  %p3739_p4 = por %p3731_p1, %p57_p0 }
  0x16   : > { %p214_p5 = scmp.ne.s32.totalorder %s3589_s25, %s3585_s24  ;;  %p215_p7 = scmp.eq.s32.totalorder %s2584_s13, 3 }
  0x17   : > { %p3745_p6 = por %p209_p3, %p208_p2  ;;  %p2585_p8 = scmp.ge.s32.totalorder %s3625_s11, 1 }
  0x18   : > { %p222_p9 = scmp.lt.s32.totalorder %s3625_s11, 5  ;;  %p3751_p10 = por %p215_p7, %p214_p5 }
  0x19   : > { %s4707_s16 = scalar_select %p3745_p6, 1, 0 }
  0x1a   : > { %s4709_s17 = scalar_select %p3751_p10, 1, 0 }
  0x1b   : > { %4708 = sst [smem:[#allocation20_spill]] %s4707_s16  ;;  %p3755_p11 = pnand %p2585_p8, %p222_p9 }
  0x1c   : > { %4710 = sst [smem:[#allocation21_spill]] %s4709_s17  ;;  %s3627_s22 = smov [#allocation5]  }
  0x1d   : > { %s4712_s1 = sld [smem:[#allocation50_spill]]  ;;  %p3250_p12 = pneg %p3755_p11 }
  0x1e   : > { %s235_s23 = sshll.u32 %s3627_s22, 4  ;;  %s4714_s3 = sld [smem:[#allocation51_spill]]  ;;  %s236_s23 = int_to_ptr.vmem [resolvable:$true] %s235_s23 }
  0x1f   : > { %p3766_p13 = pnand %p3250_p12, %p3731_p1  ;;  %s4683_s20 = smov 64  }
  0x20   : > { %s4715_s5 = sld [smem:[#allocation52_spill]]  ;;  %s3630_s13 = smov [#allocation7]  }
  0x21   : > { %s3631_s24 = smov [#allocation8]   ;;  %s34_s17 = sadd.s32 1, %s3617_s9 }
  0x22   : > { %p35_p0 = scmp.ge.s32.totalorder %s34_s17, 2  ;;  %s44_s22 = sadd.s32 1, %s3605_s29 }
  0x23   : > { %s233_s21 = sshll.u32 %s4712_s1, 4  ;;  %s4684_s1 = smov 4   ;;  %s234_s21 = int_to_ptr.hbm [resolvable:$true] %s233_s21 }
  0x24   : > { %s250_s19 = sshll.u32 %s4714_s3, 4  ;;  %s252_s3 = sshll.u32 %s3630_s13, 4  ;;  %s251_s19 = int_to_ptr.hbm [resolvable:$true] %s250_s19  ;;  %s253_s3 = int_to_ptr.vmem [resolvable:$true] %s252_s3 }
  0x25   : > { %3253 = dma.hbm_to_vmem [thread:$0]  (!%p3766_p13), %s234_s21, 1024, %s236_s23, [#allocation6], %s4683_s20, %s4683_s20, %s4684_s1  }
  0x26   : > { %s267_s12 = sshll.u32 %s4715_s5, 4  ;;  %s269_s21 = sshll.u32 %s3631_s24, 4  ;;  %s268_s12 = int_to_ptr.hbm [resolvable:$true] %s267_s12  ;;  %s270_s21 = int_to_ptr.vmem [resolvable:$true] %s269_s21 }
  0x27   : > { %3256 = dma.hbm_to_vmem [thread:$0]  (!%p3766_p13), %s251_s19, 9216, %s253_s3, [#allocation6], %s4683_s20, %s4683_s20, %s4684_s1  }
  0x28   : > { %3259 = dma.hbm_to_vmem [thread:$0]  (!%p3766_p13), %s268_s12, 1024, %s270_s21, [#allocation9], %s4683_s20, %s4683_s20, %s4684_s1  }
  0x29   : > { %s37_s23 = sadd.s32 1, %s3621_s10  ;;  %p51_p2 = scmp.ne.s32.totalorder %s3605_s29, %s3601_s28 }
  0x2a   : > { %p52_p3 = scmp.eq.s32.totalorder %s3625_s11, 0  ;;  %s4799_s17 = smov (%p35_p0, %s34_s17), 0 }
  0x2b   : > { %4716 = sst [smem:[#allocation22_spill]] %s4799_s17  ;;  %s4801_s23 = smov (!%p35_p0, %s37_s23), %s3621_s10 }
  0x2c   : > { %p3800_p5 = por %p52_p3, %p51_p2  ;;  %s194_s24 = ssub.s32 %s3617_s9, %s4799_s17 }
  0x2d   : > { %p39_p7 = scmp.ge.s32.totalorder %s4801_s23, 2  ;;  %s198_s27 = sadd.s32 1, %s3593_s26 }
  0x2e   : > { %p3271_p8 = scmp.lt.s32.totalorder %s3625_s11, 4  ;;  %s286_s19 = sand.u32 1, %s3605_s29  }
  0x2f   : > { %s4803_s23 = smov (%p39_p7, %s4801_s23), 0  ;;  %s3231_s12 = smul.u32 144, %s286_s19 }
  0x30   : > { %4718 = sst [smem:[#allocation23_spill]] %s4803_s23  ;;  %s41_s13 = ssub.s32 %s3621_s10, %s4803_s23 }
  0x31   : > { %s3232_s21 = smul.u32 144, %s3621_s10  ;;  %p42_p9 = scmp.eq.s32.totalorder %s41_s13, 0 }
  0x32   : > { %s195_s20 = sor.u32 %s194_s24, %s41_s13  ;;  %s290_s7 = scalar_lea.vmem [#allocation2], %s3231_s12 }
  0x33   : > { %p196_p12 = scmp.eq.s32.totalorder %s195_s20, 0  ;;  %s295_s16 = scalar_lea.hbm %s4673_s0, %s3232_s21 }
  0x34   : > { %s3815_s1 = scalar_select %p42_p9, %s3605_s29, %s44_s22  }
  0x35   : > { %s3818_s5 = scalar_select %p196_p12, %s3593_s26, %s198_s27  }
  0x36   : > { %s298_s8 = sshll.u32 %s290_s7, 4  ;;  %s296_s25 = sshll.u32 %s295_s16, 4  ;;  %s299_s8 = int_to_ptr.vmem [resolvable:$true] %s298_s8  ;;  %s297_s25 = int_to_ptr.hbm [resolvable:$true] %s296_s25 }
  0x37   : > { %p3261_p13 = pnand %p3271_p8, %p3800_p5  ;;  %s287_s23 = scalar_lea.sflag [#allocation3], %s286_s19 }
  0x38   : > { %s4719_s10 = smov 4   ;;  %s4720_s24 = smov 64  }
  0x39   : > { %3263 = dma.hbm_to_vmem [thread:$0]  (!%p3261_p13), %s297_s25, 2304, %s299_s8, %s287_s23, %s4720_s24, %s4720_s24, %s4719_s10  }
  0x3a   : > { %310 = sbr.rel (%p3755_p11) target bundleno = 1031 (0x407), region = 48 }
  0x3f   : > { %s312_s9 = sand.u32 1, %s3601_s28  }
  0x40   : > { %s3233_s20 = smul.u32 144, %s312_s9  ;;  %s313_s17 = scalar_lea.sflag [#allocation3], %s312_s9 }
  0x42   : > { %s316_s7 = scalar_lea.vmem [#allocation2], %s3233_s20 }
  0x43   : > { %3568 = dma.done.wait (%p3739_p4), %s313_s17, 2304  }
  0x44   : > { %3570 = vsyncadd (%p3739_p4), %s313_s17, 4294964992 }
  0x45   : > { %3572 = dma.done.wait (%p3731_p1), [#allocation6], 10240  }
  0x46   : > { %3574 = vsyncadd (%p3731_p1), [#allocation6], 4294957056 }
  0x47   : > { %3576 = dma.done.wait (%p3731_p1), [#allocation9], 1024  }
  0x48   : > { %3578 = vsyncadd (%p3731_p1), [#allocation9], 4294966272  ;;  %v3037_v0 = vld [vmem:[#allocation5 + $0x38] sm:$0xff]  ;;  %v3036_v1 = vld [vmem:[#allocation5 + $0x30] sm:$0xff]  ;;  %s3019_s25 = sshll.u32 %s3609_s30, 6  ;;  %v595_v21 = vlaneseq  ;;  %v3632_v27 = vmov 0.0  }
  0x49   : > { %516 = vmatpush.bf16.msra.mxu0 %v3037_v0  ;;  %v3035_v2 = vld [vmem:[#allocation5 + $0x28] sm:$0xff]  ;;  %v3034_v3 = vld [vmem:[#allocation5 + $0x20] sm:$0xff]  ;;  %v3033_v4 = vld [vmem:[#allocation5 + $0x18] sm:$0xff]  ;;  %s3846_s8 = scalar_lea.vmem %s316_s7, %s3019_s25 [#allocation2]  ;;  %p616_p1 = scmp.gt.s32.totalorder %s3609_s30, 0 }
  0x4a   : > { %v3032_v5 = vld [vmem:[#allocation5 + $0x10] sm:$0xff]  ;;  %v3031_v6 = vld [vmem:[#allocation5 + $0x8] sm:$0xff]  ;;  %v3030_v7 = vld [vmem:[#allocation5] sm:$0xff]  ;;  %v3856_v24 = vshrl.u32 %v595_v21, 7  ;;  %p660_p4 = scmp.lt.s32.totalorder %s3609_s30, 1  ;;  %s4774_s27 = sld [smem:[#allocation16_spill]] }
  0x4b   : > { %v3020_v8 = vld [vmem:[%s3846_s8] sm:$0xff]  ;;  %v3021_v9 = vld [vmem:[%s3846_s8 + $0x8] sm:$0xff]  ;;  %v3022_v10 = vld [vmem:[%s3846_s8 + $0x10] sm:$0xff]  ;;  %s637_s15 = scalar_select %p616_p1, 1, 0 }
  0x4c   : > { %v3023_v11 = vld [vmem:[%s3846_s8 + $0x18] sm:$0xff]  ;;  %v3024_v12 = vld [vmem:[%s3846_s8 + $0x20] sm:$0xff]  ;;  %v3025_v13 = vld [vmem:[%s3846_s8 + $0x28] sm:$0xff]  ;;  %vm744_vm0 = vcmp.ge.s32.totalorder %v3856_v24, 1  ;;  %vm772_vm2 = vcmp.lt.s32.totalorder %v3856_v24, 1  ;;  %v597_v62 = vadd.s32 8, %v3856_v24 }
  0x4d   : > { %517 = vmatpush.bf16.msra.mxu0 %v3036_v1  ;;  %v3026_v14 = vld [vmem:[%s3846_s8 + $0x30] sm:$0xff]  ;;  %v3077_v15 = vld [vmem:[#allocation7 + $0x138] sm:$0xff]  ;;  %v3075_v17 = vld [vmem:[#allocation7 + $0x128] sm:$0xff]  ;;  %v3860_v28 = vsel %vm744_vm0, 1.0, %v3632_v27  ;;  %v638_v38 = vstv %s637_s15  ;;  %vm853_vm4 = vcmp.lt.s32.totalorder %v3856_v24, 7  ;;  %s4782_s21 = sld [smem:[#allocation17_spill]] }
  0x4e   : > { %1386 = vmatpush.bf16.msra.mxu2 %v3077_v15  ;;  %v3076_v16 = vld [vmem:[#allocation7 + $0x130] sm:$0xff]  ;;  %v3074_v18 = vld [vmem:[#allocation7 + $0x120] sm:$0xff]  ;;  %v3027_v19 = vld [vmem:[%s3846_s8 + $0x38] sm:$0xff]  ;;  %vm639_vm1 = vcmp.eq.s32.totalorder %v638_v38, 1  ;;  %vm751_vm3 = vcmp.le.s32.totalorder %v597_v62, 14  ;;  %s3119_s24 = sshll.u32 %s3609_s30, 4 }
  0x4f   : > { %v3085_v20 = vld [vmem:[#allocation7 + $0x178] sm:$0xff]  ;;  %v3084_v23 = vld [vmem:[#allocation7 + $0x170] sm:$0xff]  ;;  %v3083_v26 = vld [vmem:[#allocation7 + $0x168] sm:$0xff]  ;;  %s681_s16 = scalar_select %p660_p4, 1, 0 }
  0x50   : > { %1435 = vmatpush.bf16.msra.mxu3 %v3085_v20  ;;  %v3073_v22 = vld [vmem:[#allocation7 + $0x118] sm:$0xff]  ;;  %v3072_v25 = vld [vmem:[#allocation7 + $0x110] sm:$0xff]  ;;  %v3071_v29 = vld [vmem:[#allocation7 + $0x108] sm:$0xff]  ;;  %s360_s19 = sand.u32 1, %s4774_s27   ;;  %s4783_s10 = sld [smem:[#allocation53_spill]] }
  0x51   : > { %518 = vmatpush.bf16.msra.mxu0 %v3035_v2  ;;  %v3082_v30 = vld [vmem:[#allocation7 + $0x160] sm:$0xff]  ;;  %v3081_v34 = vld [vmem:[#allocation7 + $0x158] sm:$0xff]  ;;  %v3080_v37 = vld [vmem:[#allocation7 + $0x150] sm:$0xff]  ;;  %s2595_s12 = sshll.u32 %s360_s19, 6  ;;  %s2443_s18 = scalar_lea.sflag [#allocation4], %s360_s19 }
  0x52   : > { %1387 = vmatpush.bf16.msra.mxu2 %v3076_v16  ;;  %v3070_v31 = vld [vmem:[#allocation7 + $0x100] sm:$0xff]  ;;  %v3079_v40 = vld [vmem:[#allocation7 + $0x148] sm:$0xff]  ;;  %s4564_s13 = scalar_lea.vmem [#allocation10], %s2595_s12 }
  0x53   : > { %v3866_v32 = vld [vmem:[%s4675_s2] ss:$0 sm:$0xff]  ;;  %v3029_v49 = vld [vmem:[%s3846_s8 + $0x48] sm:$0xff]  ;;  %s3014_s9 = sshll.u32 %s4782_s21, 5 }
  0x54   : > { %1436 = vmatpush.bf16.msra.mxu3 %v3084_v23  ;;  %v3028_v33 = vld [vmem:[%s3846_s8 + $0x40] sm:$0xff]  ;;  %s2455_s20 = sadd.s32 %s3119_s24, %s3014_s9 }
  0x55   : > { %519 = vmatpush.bf16.msra.mxu0 %v3034_v3  ;;  %v3078_v45 = vld [vmem:[#allocation7 + $0x140] sm:$0xff]  ;;  %s3015_s17 = sshll.u32 %s2455_s20, 2 }
  0x56   : > { %1388 = vmatpush.bf16.msra.mxu2 %v3075_v17  ;;  %s4784_s14 = smov %s4783_s10  ;;  %s2457_s15 = scalar_lea.hbm %s4783_s10, %s3015_s17 }
  0x57   : > { %s3515_s21 = scalar_lea.hbm %s4784_s14, 256 }
  0x58   : > { %1437 = vmatpush.bf16.msra.mxu3 %v3083_v26 }
  0x59   : > { %520 = vmatpush.bf16.msra.mxu0 %v3033_v4 }
  0x5a   : > { %1389 = vmatpush.bf16.msra.mxu2 %v3074_v18 }
  0x5c   : > { %1438 = vmatpush.bf16.msra.mxu3 %v3082_v30 }
  0x5d   : > { %521 = vmatpush.bf16.msra.mxu0 %v3032_v5 }
  0x5e   : > { %1390 = vmatpush.bf16.msra.mxu2 %v3073_v22 }
  0x60   : > { %1439 = vmatpush.bf16.msra.mxu3 %v3081_v34 }
  0x61   : > { %522 = vmatpush.bf16.msra.mxu0 %v3031_v6 }
  0x62   : > { %1391 = vmatpush.bf16.msra.mxu2 %v3072_v25 }
  0x64   : > { %1440 = vmatpush.bf16.msra.mxu3 %v3080_v37 }
  0x65   : > { %523 = vmatpush.bf16.msra.mxu0 %v3030_v7 }
  0x66   : > { %1392 = vmatpush.bf16.msra.mxu2 %v3071_v29 }
  0x68   : > { %524 = vmatmul.bf16.vlgmr.msra.gmra.mxu0 %v3020_v8  ;;  %1441 = vmatpush.bf16.msra.mxu3 %v3079_v40  ;;  %v3916_v8 = vsel %vm751_vm3, 1.0, %v3632_v27 }
  0x6a   : > { %1393 = vmatpush.bf16.msra.mxu2 %v3070_v31 }
  0x6c   : > { %1442 = vmatpush.bf16.msra.mxu3 %v3078_v45 }
  0x78   : > { %529 = vmatmul.bf16.gmra.mxu0 %v3021_v9 }
  0x88   : > { %534 = vmatmul.bf16.gmra.mxu0 %v3022_v10 }
  0x98   : > { %539 = vmatmul.bf16.gmra.mxu0 %v3023_v11 }
  0xa8   : > { %544 = vmatmul.bf16.gmra.mxu0 %v3024_v12 }
  0xb8   : > { %549 = vmatmul.bf16.gmra.mxu0 %v3025_v13 }
  0xc8   : > { %554 = vmatmul.bf16.gmra.mxu0 %v3026_v14 }
  0xd8   : > { %559 = vmatmul.bf16.gmra.mxu0 %v3027_v19 }
  0xe5   : > { %v525_v35 = vpop.f32.mrf.mxu0 }
  0xe6   : > { %v526_v36 = vadd.f32 %v3866_v32, %v525_v35 }
  0xe8   : > { %564 = vmatmul.bf16.gmra.mxu0 %v3028_v33  ;;  %v575_v39 = vmax.f32 %v526_v36, 0.0 }
  0xea   : > { %v3871_v43 = vsel %vm639_vm1, %v575_v39, 0.0 }
  0xeb   : > { %v756_v47 = vrot.slane %v3871_v43, 7 }
  0xed   : > { %v527_v41 = vpop.f32.mrf.mxu0 }
  0xee   : > { %v528_v42 = vadd.f32 %v3866_v32, %v527_v41 }
  0xf0   : > { %v576_v44 = vmax.f32 %v528_v42, 0.0 }
  0xf2   : > { %v3873_v46 = vsel %vm639_vm1, %v576_v44, 0.0 }
  0xf3   : > { %v4694_v48 = vrot.slane %v3873_v46, 7 }
  0xf5   : > { %v530_v50 = vpop.f32.mrf.mxu0  ;;  %v3885_v51 = vsel %vm772_vm2, %v756_v47, %v4694_v48  ;;  %v3103_v48 = vld [vmem:[#allocation7 + $0x208] sm:$0xff] }
  0xf6   : > { %v531_v52 = vadd.f32 %v3866_v32, %v530_v50 }
  0xf8   : > { %569 = vmatmul.bf16.gmra.mxu0 %v3029_v49  ;;  %v3888_v53 = vmax.f32 %v531_v52, 0.0 }
  0xfa   : > { %v823_v57 = vpack.c.bf16 %v3888_v53, %v3888_v53  ;;  %v3903_v2 = vrot.slane %v3888_v53, 1 }
  0xfc   : > { %v968_v59 = vunpack.c.l.b16 %v823_v57 }
  0xfd   : > { %v532_v54 = vpop.f32.mrf.mxu0 }
  0xfe   : > { %v533_v55 = vadd.f32 %v3866_v32, %v532_v54 }
 0x100   : > { %v3891_v56 = vmax.f32 %v533_v55, 0.0 }
 0x102   : > { %v824_v58 = vpack.c.bf16 %v3891_v56, %v3891_v56  ;;  %v840_v63 = vrot.slane %v3891_v56, 1  ;;  %v759_v4 = vrot.slane %v3891_v56, 7 }
 0x104   : > { %v969_v60 = vunpack.c.l.b16 %v824_v58  ;;  %v866_v7 = vsel %vm853_vm4, %v3903_v2, %v840_v63 }
 0x105   : > { %v535_v61 = vpop.f32.mrf.mxu0  ;;  %v888_v13 = vpack.c.bf16 %v866_v7, %v866_v7 }
 0x106   : > { %v536_v0 = vadd.f32 %v3866_v32, %v535_v61  ;;  %v3900_v1 = vpack.c.b16 %v969_v60, %v968_v59 }
 0x107   : > { %v1016_v19 = vunpack.c.l.b16 %v888_v13 }
 0x108   : > { %v579_v3 = vmax.f32 %v536_v0, 0.0  ;;  %1394 = vmatmul.bf16.vlgmr.msra.gmra.mxu2 %v3900_v1 }
 0x10a   : > { %v3908_v5 = vrot.slane %v579_v3, 7  ;;  %v3910_v6 = vrot.slane %v579_v3, 1  ;;  %v825_v17 = vpack.c.bf16 %v579_v3, %v579_v3 }
 0x10c   : > { %v865_v9 = vsel %vm853_vm4, %v840_v63, %v3910_v6  ;;  %v784_v10 = vsel %vm772_vm2, %v759_v4, %v3908_v5  ;;  %v970_v26 = vunpack.c.l.b16 %v825_v17 }
 0x10d   : > { %v537_v11 = vpop.f32.mrf.mxu0  ;;  %v873_v12 = vmul.f32 %v3916_v8, %v865_v9  ;;  %v793_v16 = vmul.f32 %v3860_v28, %v784_v10 }
 0x10e   : > { %v538_v14 = vadd.f32 %v3866_v32, %v537_v11 }
 0x10f   : > { %v889_v15 = vpack.c.bf16 %v873_v12, %v873_v12  ;;  %v809_v25 = vpack.c.bf16 %v793_v16, %v793_v16 }
 0x110   : > { %v580_v18 = vmax.f32 %v538_v14, 0.0 }
 0x111   : > { %v1017_v20 = vunpack.c.l.b16 %v889_v15  ;;  %v922_v36 = vunpack.c.l.b16 %v809_v25 }
 0x112   : > { %v761_v21 = vrot.slane %v580_v18, 7  ;;  %v826_v22 = vpack.c.bf16 %v580_v18, %v580_v18  ;;  %v842_v33 = vrot.slane %v580_v18, 1 }
 0x113   : > { %v3929_v23 = vpack.c.b16 %v1017_v20, %v1016_v19 }
 0x114   : > { %v971_v27 = vunpack.c.l.b16 %v826_v22  ;;  %v783_v29 = vsel %vm772_vm2, %v3908_v5, %v761_v21  ;;  %v864_v42 = vsel %vm853_vm4, %v3910_v6, %v842_v33 }
 0x115   : > { %v540_v30 = vpop.f32.mrf.mxu0  ;;  %1443 = vmatmul.bf16.vlgmr.msra.gmra.mxu3 %v3929_v23  ;;  %v810_v31 = vpack.c.bf16 %v783_v29, %v783_v29  ;;  %v890_v52 = vpack.c.bf16 %v864_v42, %v864_v42 }
 0x116   : > { %v541_v34 = vadd.f32 %v3866_v32, %v540_v30  ;;  %v3936_v35 = vpack.c.b16 %v971_v27, %v970_v26 }
 0x117   : > { %v3938_v37 = vunpack.c.l.b16 %v810_v31  ;;  %v1018_v60 = vunpack.c.l.b16 %v890_v52 }
 0x118   : > { %v581_v38 = vmax.f32 %v541_v34, 0.0  ;;  %1399 = vmatmul.bf16.gmra.mxu2 %v3936_v35 }
 0x119   : > { %v3942_v39 = vpack.c.b16 %v3938_v37, %v922_v36 }
 0x11a   : > { %v762_v40 = vrot.slane %v581_v38, 7  ;;  %v843_v41 = vrot.slane %v581_v38, 1  ;;  %v827_v58 = vpack.c.bf16 %v581_v38, %v581_v38 }
 0x11c   : > { %v863_v44 = vsel %vm853_vm4, %v842_v33, %v843_v41  ;;  %v782_v45 = vsel %vm772_vm2, %v761_v21, %v762_v40  ;;  %v972_v7 = vunpack.c.l.b16 %v827_v58 }
 0x11d   : > { %v542_v49 = vpop.f32.mrf.mxu0  ;;  %v875_v50 = vmul.f32 %v3916_v8, %v863_v44  ;;  %v795_v57 = vmul.f32 %v3860_v28, %v782_v45 }
 0x11e   : > { %v543_v54 = vadd.f32 %v3866_v32, %v542_v49 }
 0x11f   : > { %v891_v55 = vpack.c.bf16 %v875_v50, %v875_v50  ;;  %v811_v3 = vpack.c.bf16 %v795_v57, %v795_v57 }
 0x120   : > { %v582_v59 = vmax.f32 %v543_v54, 0.0 }
 0x121   : > { %v1019_v61 = vunpack.c.l.b16 %v891_v55  ;;  %v924_v16 = vunpack.c.l.b16 %v811_v3 }
 0x122   : > { %v763_v62 = vrot.slane %v582_v59, 7  ;;  %v828_v63 = vpack.c.bf16 %v582_v59, %v582_v59  ;;  %v844_v13 = vrot.slane %v582_v59, 1 }
 0x123   : > { %v3954_v0 = vpack.c.b16 %v1019_v61, %v1018_v60 }
 0x124   : > { %v973_v9 = vunpack.c.l.b16 %v828_v63  ;;  %v781_v10 = vsel %vm772_vm2, %v762_v40, %v763_v62  ;;  %v862_v22 = vsel %vm853_vm4, %v843_v41, %v844_v13 }
 0x125   : > { %v545_v11 = vpop.f32.mrf.mxu0  ;;  %1448 = vmatmul.bf16.gmra.mxu3 %v3954_v0  ;;  %v812_v12 = vpack.c.bf16 %v781_v10, %v781_v10  ;;  %v892_v30 = vpack.c.bf16 %v862_v22, %v862_v22 }
 0x126   : > { %v546_v14 = vadd.f32 %v3866_v32, %v545_v11  ;;  %v3960_v15 = vpack.c.b16 %v973_v9, %v972_v7 }
 0x127   : > { %v925_v17 = vunpack.c.l.b16 %v812_v12  ;;  %v1020_v40 = vunpack.c.l.b16 %v892_v30  ;;  %v3069_v12 = vld [vmem:[#allocation7 + $0xf8] sm:$0xff] }
 0x128   : > { %v583_v18 = vmax.f32 %v546_v14, 0.0  ;;  %1404 = vmatmul.bf16.gmra.mxu2 %v3960_v15  ;;  %1337 = vmatpush.bf16.msra.mxu1 %v3069_v12  ;;  %v3065_v12 = vld [vmem:[#allocation7 + $0xd8] sm:$0xff] }
 0x129   : > { %v3963_v19 = vpack.c.b16 %v925_v17, %v924_v16 }
 0x12a   : > { %v764_v20 = vrot.slane %v583_v18, 7  ;;  %v845_v21 = vrot.slane %v583_v18, 1  ;;  %v829_v36 = vpack.c.bf16 %v583_v18, %v583_v18 }
 0x12c   : > { %v861_v25 = vsel %vm853_vm4, %v844_v13, %v845_v21  ;;  %v780_v26 = vsel %vm772_vm2, %v763_v62, %v764_v20  ;;  %v974_v50 = vunpack.c.l.b16 %v829_v36 }
 0x12d   : > { %v547_v27 = vpop.f32.mrf.mxu0  ;;  %v877_v29 = vmul.f32 %v3916_v8, %v861_v25  ;;  %v797_v34 = vmul.f32 %v3860_v28, %v780_v26 }
 0x12e   : > { %v548_v31 = vadd.f32 %v3866_v32, %v547_v27 }
 0x12f   : > { %v893_v33 = vpack.c.bf16 %v877_v29, %v877_v29  ;;  %v813_v49 = vpack.c.bf16 %v797_v34, %v797_v34 }
 0x130   : > { %v584_v38 = vmax.f32 %v548_v31, 0.0 }
 0x131   : > { %v1021_v42 = vunpack.c.l.b16 %v893_v33  ;;  %v926_v61 = vunpack.c.l.b16 %v813_v49 }
 0x132   : > { %v765_v41 = vrot.slane %v584_v38, 7  ;;  %v830_v44 = vpack.c.bf16 %v584_v38, %v584_v38  ;;  %v846_v58 = vrot.slane %v584_v38, 1 }
 0x133   : > { %v3974_v45 = vpack.c.b16 %v1021_v42, %v1020_v40  ;;  %v3067_v40 = vld [vmem:[#allocation7 + $0xe8] sm:$0xff] }
 0x134   : > { %v975_v52 = vunpack.c.l.b16 %v830_v44  ;;  %v779_v54 = vsel %vm772_vm2, %v764_v20, %v765_v41  ;;  %v860_v10 = vsel %vm853_vm4, %v845_v21, %v846_v58  ;;  %v3068_v21 = vld [vmem:[#allocation7 + $0xf0] sm:$0xff] }
 0x135   : > { %v550_v55 = vpop.f32.mrf.mxu0  ;;  %1453 = vmatmul.bf16.gmra.mxu3 %v3974_v45  ;;  %v814_v57 = vpack.c.bf16 %v779_v54, %v779_v54  ;;  %v894_v17 = vpack.c.bf16 %v860_v10, %v860_v10  ;;  %1338 = vmatpush.bf16.msra.mxu1 %v3068_v21  ;;  %v3053_v54 = vld [vmem:[#allocation7 + $0x78] sm:$0xff]  ;;  %v3052_v10 = vld [vmem:[#allocation7 + $0x70] sm:$0xff] }
 0x136   : > { %v551_v59 = vadd.f32 %v3866_v32, %v550_v55  ;;  %v3980_v60 = vpack.c.b16 %v975_v52, %v974_v50  ;;  %1677 = vmatpush.bf16.msrb.mxu2 %v3053_v54 }
 0x137   : > { %v927_v62 = vunpack.c.l.b16 %v814_v57  ;;  %v1022_v27 = vunpack.c.l.b16 %v894_v17 }
 0x138   : > { %v585_v63 = vmax.f32 %v551_v59, 0.0  ;;  %1409 = vmatmul.bf16.gmra.mxu2 %v3980_v60  ;;  %v3066_v59 = vld [vmem:[#allocation7 + $0xe0] sm:$0xff] }
 0x139   : > { %v3983_v3 = vpack.c.b16 %v927_v62, %v926_v61  ;;  %1339 = vmatpush.bf16.msra.mxu1 %v3067_v40  ;;  %v3050_v40 = vld [vmem:[#allocation7 + $0x60] sm:$0xff] }
 0x13a   : > { %v766_v7 = vrot.slane %v585_v63, 7  ;;  %v847_v9 = vrot.slane %v585_v63, 1  ;;  %v831_v25 = vpack.c.bf16 %v585_v63, %v585_v63  ;;  %1678 = vmatpush.bf16.msrb.mxu2 %v3052_v10 }
 0x13c   : > { %v859_v11 = vsel %vm853_vm4, %v846_v58, %v847_v9  ;;  %v778_v13 = vsel %vm772_vm2, %v765_v41, %v766_v7  ;;  %v976_v36 = vunpack.c.l.b16 %v831_v25 }
 0x13d   : > { %v552_v14 = vpop.f32.mrf.mxu0  ;;  %v879_v16 = vmul.f32 %v3916_v8, %v859_v11  ;;  %v799_v22 = vmul.f32 %v3860_v28, %v778_v13  ;;  %1340 = vmatpush.bf16.msra.mxu1 %v3066_v59 }
 0x13e   : > { %v553_v18 = vadd.f32 %v3866_v32, %v552_v14 }
 0x13f   : > { %v895_v20 = vpack.c.bf16 %v879_v16, %v879_v16  ;;  %v815_v34 = vpack.c.bf16 %v799_v22, %v799_v22 }
 0x140   : > { %v586_v26 = vmax.f32 %v553_v18, 0.0  ;;  %v3093_v18 = vld [vmem:[#allocation7 + $0x1b8] sm:$0xff] }
 0x141   : > { %v1023_v29 = vunpack.c.l.b16 %v895_v20  ;;  %v928_v55 = vunpack.c.l.b16 %v815_v34  ;;  %1341 = vmatpush.bf16.msra.mxu1 %v3065_v12  ;;  %2018 = vmatpush.bf16.msrb.mxu0 %v3093_v18 }
 0x142   : > { %v767_v30 = vrot.slane %v586_v26, 7  ;;  %v832_v31 = vpack.c.bf16 %v586_v26, %v586_v26  ;;  %v848_v49 = vrot.slane %v586_v26, 1 }
 0x143   : > { %v3994_v33 = vpack.c.b16 %v1023_v29, %v1022_v27  ;;  %v3064_v27 = vld [vmem:[#allocation7 + $0xd0] sm:$0xff] }
 0x144   : > { %v977_v38 = vunpack.c.l.b16 %v832_v31  ;;  %v777_v42 = vsel %vm772_vm2, %v766_v7, %v767_v30  ;;  %v858_v7 = vsel %vm853_vm4, %v847_v9, %v848_v49  ;;  %v3051_v9 = vld [vmem:[#allocation7 + $0x68] sm:$0xff]  ;;  %v3092_v31 = vld [vmem:[#allocation7 + $0x1b0] sm:$0xff] }
 0x145   : > { %v555_v41 = vpop.f32.mrf.mxu0  ;;  %1458 = vmatmul.bf16.gmra.mxu3 %v3994_v33  ;;  %v816_v44 = vpack.c.bf16 %v777_v42, %v777_v42  ;;  %v896_v17 = vpack.c.bf16 %v858_v7, %v858_v7  ;;  %1679 = vmatpush.bf16.msrb.mxu2 %v3051_v9 }
 0x146   : > { %v556_v50 = vadd.f32 %v3866_v32, %v555_v41  ;;  %v4000_v52 = vpack.c.b16 %v977_v38, %v976_v36  ;;  %1342 = vmatpush.bf16.msra.mxu1 %v3064_v27  ;;  %2019 = vmatpush.bf16.msrb.mxu0 %v3092_v31 }
 0x147   : > { %v929_v57 = vunpack.c.l.b16 %v816_v44  ;;  %v1024_v29 = vunpack.c.l.b16 %v896_v17  ;;  %v3090_v17 = vld [vmem:[#allocation7 + $0x1a0] sm:$0xff] }
 0x148   : > { %v4002_v58 = vmax.f32 %v556_v50, 0.0  ;;  %1414 = vmatmul.bf16.gmra.mxu2 %v4000_v52  ;;  %v3061_v50 = vld [vmem:[#allocation7 + $0xb8] sm:$0xff] }
 0x149   : > { %v4005_v61 = vpack.c.b16 %v929_v57, %v928_v55  ;;  %1680 = vmatpush.bf16.msrb.mxu2 %v3050_v40  ;;  %v3091_v57 = vld [vmem:[#allocation7 + $0x1a8] sm:$0xff]  ;;  %1726 = vmatpush.bf16.msrb.mxu3 %v3061_v50  ;;  %v3058_v50 = vld [vmem:[#allocation7 + $0xa0] sm:$0xff] }
 0x14a   : > { %v768_v62 = vrot.slane %v4002_v58, 7  ;;  %v849_v63 = vrot.slane %v4002_v58, 1  ;;  %v833_v26 = vpack.c.bf16 %v4002_v58, %v4002_v58  ;;  %2020 = vmatpush.bf16.msrb.mxu0 %v3091_v57 }
 0x14c   : > { %v857_v11 = vsel %vm853_vm4, %v848_v49, %v849_v63  ;;  %v776_v13 = vsel %vm772_vm2, %v767_v30, %v768_v62  ;;  %v978_v41 = vunpack.c.l.b16 %v833_v26  ;;  %v3063_v49 = vld [vmem:[#allocation7 + $0xc8] sm:$0xff] }
 0x14d   : > { %v557_v14 = vpop.f32.mrf.mxu0  ;;  %v881_v16 = vmul.f32 %v3916_v8, %v857_v11  ;;  %v801_v25 = vmul.f32 %v3860_v28, %v776_v13  ;;  %1343 = vmatpush.bf16.msra.mxu1 %v3063_v49  ;;  %v3049_v11 = vld [vmem:[#allocation7 + $0x58] sm:$0xff] }
 0x14e   : > { %v558_v20 = vadd.f32 %v3866_v32, %v557_v14  ;;  %1681 = vmatpush.bf16.msrb.mxu2 %v3049_v11  ;;  %2021 = vmatpush.bf16.msrb.mxu0 %v3090_v17 }
 0x14f   : > { %v897_v22 = vpack.c.bf16 %v881_v16, %v881_v16  ;;  %v817_v42 = vpack.c.bf16 %v801_v25, %v801_v25  ;;  %v3060_v16 = vld [vmem:[#allocation7 + $0xb0] sm:$0xff] }
 0x150   : > { %v588_v21 = vmax.f32 %v558_v20, 0.0  ;;  %1727 = vmatpush.bf16.msrb.mxu3 %v3060_v16  ;;  %v3048_v25 = vld [vmem:[#allocation7 + $0x50] sm:$0xff]  ;;  %v3046_v16 = vld [vmem:[#allocation7 + $0x40] sm:$0xff] }
 0x151   : > { %v1025_v30 = vunpack.c.l.b16 %v897_v22  ;;  %v930_v12 = vunpack.c.l.b16 %v817_v42 }
 0x152   : > { %v769_v34 = vrot.slane %v588_v21, 7  ;;  %v834_v36 = vpack.c.bf16 %v588_v21, %v588_v21  ;;  %v850_v59 = vrot.slane %v588_v21, 1  ;;  %v3059_v21 = vld [vmem:[#allocation7 + $0xa8] sm:$0xff]  ;;  %1682 = vmatpush.bf16.msrb.mxu2 %v3048_v25 }
 0x153   : > { %v4020_v38 = vpack.c.b16 %v1025_v30, %v1024_v29 }
 0x154   : > { %v979_v44 = vunpack.c.l.b16 %v834_v36  ;;  %v775_v54 = vsel %vm772_vm2, %v768_v62, %v769_v34  ;;  %v3062_v62 = vld [vmem:[#allocation7 + $0xc0] sm:$0xff]  ;;  %v856_v9 = vsel %vm853_vm4, %v849_v63, %v850_v59  ;;  %v3089_v36 = vld [vmem:[#allocation7 + $0x198] sm:$0xff]  ;;  %1728 = vmatpush.bf16.msrb.mxu3 %v3059_v21 }
 0x155   : > { %v560_v55 = vpop.f32.mrf.mxu0  ;;  %1463 = vmatmul.bf16.gmra.mxu3 %v4020_v38  ;;  %v818_v58 = vpack.c.bf16 %v775_v54, %v775_v54  ;;  %1344 = vmatpush.bf16.msra.mxu1 %v3062_v62  ;;  %v898_v31 = vpack.c.bf16 %v856_v9, %v856_v9  ;;  %v3057_v21 = vld [vmem:[#allocation7 + $0x98] sm:$0xff] }
 0x156   : > { %v561_v7 = vadd.f32 %v3866_v32, %v560_v55  ;;  %v4026_v10 = vpack.c.b16 %v979_v44, %v978_v41  ;;  %2022 = vmatpush.bf16.msrb.mxu0 %v3089_v36  ;;  %v3047_v41 = vld [vmem:[#allocation7 + $0x48] sm:$0xff] }
 0x157   : > { %v931_v13 = vunpack.c.l.b16 %v818_v58  ;;  %v1026_v54 = vunpack.c.l.b16 %v898_v31  ;;  %1683 = vmatpush.bf16.msrb.mxu2 %v3047_v41 }
 0x158   : > { %v589_v14 = vmax.f32 %v561_v7, 0.0  ;;  %1419 = vmatmul.bf16.gmra.mxu2 %v4026_v10  ;;  %1729 = vmatpush.bf16.msrb.mxu3 %v3058_v50  ;;  %v837_v7 = vrot.slane %v3871_v43, 1 }
 0x159   : > { %v4029_v18 = vpack.c.b16 %v931_v13, %v930_v12 }
 0x15a   : > { %v770_v20 = vrot.slane %v589_v14, 7  ;;  %v851_v22 = vrot.slane %v589_v14, 1  ;;  %v835_v63 = vpack.c.bf16 %v589_v14, %v589_v14 }
 0x15b   : > { %1684 = vmatpush.bf16.msrb.mxu2 %v3046_v16 }
 0x15c   : > { %v855_v26 = vsel %vm853_vm4, %v850_v59, %v851_v22  ;;  %v774_v27 = vsel %vm772_vm2, %v769_v34, %v770_v20  ;;  %v3088_v34 = vld [vmem:[#allocation7 + $0x190] sm:$0xff]  ;;  %v980_v12 = vunpack.c.l.b16 %v835_v63  ;;  %1730 = vmatpush.bf16.msrb.mxu3 %v3057_v21 }
 0x15d   : > { %v562_v29 = vpop.f32.mrf.mxu0  ;;  %v883_v30 = vmul.f32 %v3916_v8, %v855_v26  ;;  %v803_v44 = vmul.f32 %v3860_v28, %v774_v27  ;;  %2023 = vmatpush.bf16.msrb.mxu0 %v3088_v34  ;;  %v3045_v26 = vld [vmem:[#allocation7 + $0x38] sm:$0xff]  ;;  %v3087_v27 = vld [vmem:[#allocation7 + $0x188] sm:$0xff]  ;;  %v3044_v21 = vld [vmem:[#allocation7 + $0x30] sm:$0xff] }
 0x15e   : > { %v563_v40 = vadd.f32 %v3866_v32, %v562_v29  ;;  %1628 = vmatpush.bf16.msrb.mxu1 %v3045_v26 }
 0x15f   : > { %v899_v42 = vpack.c.bf16 %v883_v30, %v883_v30  ;;  %v819_v13 = vpack.c.bf16 %v803_v44, %v803_v44  ;;  %v3056_v44 = vld [vmem:[#allocation7 + $0x90] sm:$0xff] }
 0x160   : > { %v590_v49 = vmax.f32 %v563_v40, 0.0  ;;  %1731 = vmatpush.bf16.msrb.mxu3 %v3056_v44 }
 0x161   : > { %v1027_v55 = vunpack.c.l.b16 %v899_v42  ;;  %v932_v63 = vunpack.c.l.b16 %v819_v13  ;;  %2024 = vmatpush.bf16.msrb.mxu0 %v3087_v27  ;;  %v3086_v13 = vld [vmem:[#allocation7 + $0x180] sm:$0xff]  ;;  %v3055_v27 = vld [vmem:[#allocation7 + $0x88] sm:$0xff] }
 0x162   : > { %v771_v57 = vrot.slane %v590_v49, 7  ;;  %v852_v58 = vrot.slane %v590_v49, 1  ;;  %v836_v59 = vpack.c.bf16 %v590_v49, %v590_v49  ;;  %1629 = vmatpush.bf16.msrb.mxu1 %v3044_v21 }
 0x163   : > { %v4041_v11 = vpack.c.b16 %v1027_v55, %v1026_v54 }
 0x164   : > { %v981_v14 = vunpack.c.l.b16 %v836_v59  ;;  %v854_v62 = vsel %vm853_vm4, %v851_v22, %v852_v58  ;;  %v773_v17 = vsel %vm772_vm2, %v770_v20, %v771_v57  ;;  %v788_v9 = vsel %vm772_vm2, %v771_v57, %v756_v47  ;;  %1732 = vmatpush.bf16.msrb.mxu3 %v3055_v27 }
 0x165   : > { %v565_v25 = vpop.f32.mrf.mxu0  ;;  %1468 = vmatmul.bf16.gmra.mxu3 %v4041_v11  ;;  %v820_v29 = vpack.c.bf16 %v773_v17, %v773_v17  ;;  %v789_v30 = vmul.f32 %v3860_v28, %v788_v9  ;;  %v806_v22 = vpack.c.bf16 %v3885_v51, %v3885_v51  ;;  %v869_v20 = vsel %vm853_vm4, %v852_v58, %v837_v7 }
 0x166   : > { %v566_v31 = vadd.f32 %v3866_v32, %v565_v25  ;;  %v4060_v47 = vpack.c.b16 %v981_v14, %v980_v12  ;;  %v900_v36 = vpack.c.bf16 %v854_v62, %v854_v62  ;;  %v885_v40 = vmul.f32 %v3916_v8, %v869_v20  ;;  %2025 = vmatpush.bf16.msrb.mxu0 %v3086_v13 }
 0x167   : > { %v933_v42 = vunpack.c.l.b16 %v820_v29  ;;  %v805_v41 = vpack.c.bf16 %v789_v30, %v789_v30  ;;  %v4070_v55 = vunpack.c.l.b16 %v806_v22 }
 0x168   : > { %v4063_v51 = vmax.f32 %v566_v31, 0.0  ;;  %1424 = vmatmul.bf16.gmra.mxu2 %v4060_v47  ;;  %v901_v49 = vpack.c.bf16 %v885_v40, %v885_v40  ;;  %v4074_v12 = vunpack.c.l.b16 %v900_v36 }
 0x169   : > { %v4066_v50 = vpack.c.b16 %v933_v42, %v932_v63  ;;  %v4068_v54 = vunpack.c.l.b16 %v805_v41 }
 0x16a   : > { %v1094_v34 = vrot.slane %v4063_v51, 7  ;;  %v1107_v59 = vrot.slane %v4063_v51, 1  ;;  %v4076_v14 = vunpack.c.l.b16 %v901_v49  ;;  %v1105_v22 = vpack.c.bf16 %v4063_v51, %v4063_v51 }
 0x16b   : > { %v934_v62 = vpack.c.b16 %v4070_v55, %v4068_v54  ;;  %v682_v51 = vstv %s681_s16  ;;  %s2458_s16 = sshll.u32 %s4564_s13, 4  ;;  %s2459_s16 = int_to_ptr.vmem [resolvable:$true] %s2458_s16 }
 0x16c   : > { %v1110_v16 = vsel %vm853_vm4, %v852_v58, %v1107_v59  ;;  %v1097_v17 = vsel %vm772_vm2, %v771_v57, %v1094_v34  ;;  %v3054_v58 = vld [vmem:[#allocation7 + $0x80] sm:$0xff]  ;;  %v4092_v57 = vrot.slane %v3888_v53, 7  ;;  %v1130_v49 = vunpack.c.l.b16 %v1105_v22 }
 0x16d   : > { %v567_v25 = vpop.f32.mrf.mxu0  ;;  %v1112_v26 = vmul.f32 %v3916_v8, %v1110_v16  ;;  %v1100_v31 = vmul.f32 %v3860_v28, %v1097_v17  ;;  %1733 = vmatpush.bf16.msrb.mxu3 %v3054_v58  ;;  %vm4116_vm5 = vcmp.eq.s32.totalorder %v682_v51, 1  ;;  %v4725_v54 = vpack.c.b16 %v4076_v14, %v4074_v12 }
 0x16e   : > { %v568_v29 = vadd.f32 %v3866_v32, %v567_v25  ;;  %v785_v41 = vsel %vm772_vm2, %v4092_v57, %v759_v4 }
 0x16f   : > { %v1115_v30 = vpack.c.bf16 %v1112_v26, %v1112_v26  ;;  %v1103_v56 = vpack.c.bf16 %v1100_v31, %v1100_v31  ;;  %v808_v4 = vpack.c.bf16 %v785_v41, %v785_v41 }
 0x170   : > { %v592_v20 = vmax.f32 %v568_v29, 0.0 }
 0x171   : > { %v1137_v36 = vunpack.c.l.b16 %v1115_v30  ;;  %v1122_v31 = vunpack.c.l.b16 %v1103_v56 }
 0x172   : > { %v1095_v40 = vrot.slane %v592_v20, 7  ;;  %v1108_v63 = vrot.slane %v592_v20, 1  ;;  %v1106_v42 = vpack.c.bf16 %v592_v20, %v592_v20 }
 0x173   : > { %v4101_v44 = vpack.c.b16 %v1137_v36, %v4074_v12 }
 0x174   : > { %v1131_v53 = vunpack.c.l.b16 %v1106_v42  ;;  %v1098_v13 = vsel %vm772_vm2, %v1095_v40, %v4092_v57  ;;  %v1111_v16 = vsel %vm853_vm4, %v1108_v63, %v3903_v2  ;;  %v1096_v26 = vsel %vm772_vm2, %v1094_v34, %v1095_v40 }
 0x175   : > { %v570_v17 = vpop.f32.mrf.mxu0  ;;  %1473 = vmatmul.bf16.gmra.mxu3 %v4101_v44  ;;  %v1099_v25 = vmul.f32 %v3860_v28, %v1098_v13  ;;  %v1104_v29 = vpack.c.bf16 %v1096_v26, %v1096_v26  ;;  %v1114_v58 = vmul.f32 %v3916_v8, %v1111_v16  ;;  %v4122_v42 = vunpack.c.l.b16 %v808_v4  ;;  %v3043_v26 = vld [vmem:[#allocation7 + $0x28] sm:$0xff] }
 0x176   : > { %v571_v21 = vadd.f32 %v3866_v32, %v570_v17  ;;  %v4114_v27 = vpack.c.b16 %v1131_v53, %v1130_v49  ;;  %v1109_v51 = vsel %vm853_vm4, %v1107_v59, %v1108_v63  ;;  %1630 = vmatpush.bf16.msrb.mxu1 %v3043_v26 }
 0x177   : > { %v1102_v22 = vpack.c.bf16 %v1099_v25, %v1099_v25  ;;  %v1123_v36 = vunpack.c.l.b16 %v1104_v29  ;;  %v1117_v56 = vpack.c.bf16 %v1114_v58, %v1114_v58  ;;  %v1116_v4 = vpack.c.bf16 %v1109_v51, %v1109_v51 }
 0x178   : > { %v593_v20 = vmax.f32 %v571_v21, 0.0  ;;  %1429 = vmatmul.bf16.gmra.mxu2 %v4114_v27  ;;  %v822_v25 = vpack.c.bf16 %v3873_v46, %v3873_v46  ;;  %v821_v58 = vpack.c.bf16 %v3871_v43, %v3871_v43 }
 0x179   : > { %v1121_v34 = vunpack.c.l.b16 %v1102_v22  ;;  %v4130_v49 = vpack.c.b16 %v1123_v36, %v1122_v31  ;;  %v4146_v51 = vunpack.c.l.b16 %v1116_v4 }
 0x17a   : > { %v4126_v41 = vsel %vm4116_vm5, %v593_v20, 0.0  ;;  %v1139_v20 = vunpack.c.l.b16 %v1117_v56 }
 0x17b   : > { %v1775_v53 = vrot.slane %v4126_v41, 7  ;;  %v1788_v13 = vrot.slane %v4126_v41, 1  ;;  %v1124_v16 = vpack.c.b16 %v4122_v42, %v1121_v34 }
 0x17c   : > { %v1141_v26 = vpack.c.b16 %v1139_v20, %v4146_v51 }
 0x17d   : > { %v572_v17 = vpop.f32.mrf.mxu0  ;;  %1345 = vmatmul.bf16.vlgmr.msra.gmra.mxu1 %v1124_v16  ;;  %v1778_v21 = vsel %vm772_vm2, %v1095_v40, %v1775_v53  ;;  %v1791_v59 = vsel %vm853_vm4, %v1108_v63, %v1788_v13  ;;  %v967_v16 = vunpack.c.l.b16 %v822_v25  ;;  %v838_v40 = vrot.slane %v3873_v46, 1 }
 0x17e   : > { %v573_v29 = vadd.f32 %v3866_v32, %v572_v17  ;;  %v1793_v22 = vmul.f32 %v3916_v8, %v1791_v59  ;;  %v1781_v36 = vmul.f32 %v3860_v28, %v1778_v21  ;;  %v966_v17 = vunpack.c.l.b16 %v821_v58  ;;  %v3104_v21 = vld [vmem:[#allocation7 + $0x210] sm:$0xff] }
 0x17f   : > { %v867_v4 = vsel %vm853_vm4, %v838_v40, %v3903_v2 }
 0x180   : > { %v594_v31 = vmax.f32 %v573_v29, 0.0  ;;  %v1796_v34 = vpack.c.bf16 %v1793_v22, %v1793_v22  ;;  %v1784_v25 = vpack.c.bf16 %v1781_v36, %v1781_v36  ;;  %v982_v30 = vpack.c.b16 %v967_v16, %v966_v17 }
 0x182   : > { %v4151_v63 = vsel %vm4116_vm5, %v594_v31, 0.0  ;;  %v4153_v32 = vunpack.c.l.b16 %v1796_v34  ;;  %v871_v34 = vmul.f32 %v3916_v8, %v867_v4  ;;  %v4176_v17 = vunpack.c.l.b16 %v1784_v25 }
 0x183   : > { %v1776_v59 = vrot.slane %v4151_v63, 7  ;;  %v1789_v56 = vrot.slane %v4151_v63, 1 }
 0x184   : > { %v887_v4 = vpack.c.bf16 %v871_v34, %v871_v34 }
 0x185   : > { %1478 = vmatmul.bf16.gmra.mxu3 %v1141_v26  ;;  %v1779_v29 = vsel %vm772_vm2, %v1776_v59, %v3908_v5  ;;  %v1777_v22 = vsel %vm772_vm2, %v1775_v53, %v1776_v59  ;;  %v1790_v58 = vsel %vm853_vm4, %v1788_v13, %v1789_v56  ;;  %v1792_v2 = vsel %vm853_vm4, %v1789_v56, %v3910_v6 }
 0x186   : > { %v1780_v20 = vmul.f32 %v3860_v28, %v1779_v29  ;;  %v1785_v31 = vpack.c.bf16 %v1777_v22, %v1777_v22  ;;  %v1797_v36 = vpack.c.bf16 %v1790_v58, %v1790_v58  ;;  %v1795_v16 = vmul.f32 %v3916_v8, %v1792_v2  ;;  %v3042_v29 = vld [vmem:[#allocation7 + $0x20] sm:$0xff]  ;;  %v3040_v2 = vld [vmem:[#allocation7 + $0x10] sm:$0xff]  ;;  %v3095_v22 = vld [vmem:[#allocation7 + $0x1c8] sm:$0xff] }
 0x187   : > { %v868_v6 = vsel %vm853_vm4, %v837_v7, %v838_v40  ;;  %v1015_v43 = vunpack.c.l.b16 %v887_v4  ;;  %1631 = vmatpush.bf16.msrb.mxu1 %v3042_v29  ;;  %v3098_v29 = vld [vmem:[#allocation7 + $0x1e0] sm:$0xff] }
 0x188   : > { %1685 = vmatmul.bf16.vlgmr.msrb.gmra.mxu2 %v982_v30  ;;  %v1783_v5 = vpack.c.bf16 %v1780_v20, %v1780_v20  ;;  %v4178_v53 = vunpack.c.l.b16 %v1785_v31  ;;  %v1798_v59 = vpack.c.bf16 %v1795_v16, %v1795_v16  ;;  %v4180_v13 = vunpack.c.l.b16 %v1797_v36  ;;  %v3039_v36 = vld [vmem:[#allocation7 + $0x8] sm:$0xff]  ;;  %v3101_v16 = vld [vmem:[#allocation7 + $0x1f8] sm:$0xff] }
 0x189   : > { %v886_v30 = vpack.c.bf16 %v868_v6, %v868_v6  ;;  %2067 = vmatpush.bf16.msra.mxu0 %v3101_v16  ;;  %v3099_v6 = vld [vmem:[#allocation7 + $0x1e8] sm:$0xff] }
 0x18a   : > { %v1802_v26 = vunpack.c.l.b16 %v1783_v5  ;;  %v4188_v8 = vunpack.c.l.b16 %v1798_v59  ;;  %v3100_v5 = vld [vmem:[#allocation7 + $0x1f0] sm:$0xff] }
 0x18b   : > { %v1014_v58 = vunpack.c.l.b16 %v886_v30  ;;  %v4194_v40 = vpop.f32.mrf.mxu2  ;;  %v3038_v30 = vld [vmem:[#allocation7] sm:$0xff] }
 0x18c   : > { %v1805_v25 = vpack.c.b16 %v3938_v37, %v1802_v26  ;;  %v3041_v37 = vld [vmem:[#allocation7 + $0x18] sm:$0xff] }
 0x18d   : > { %1350 = vmatmul.bf16.gmra.mxu1 %v3942_v39  ;;  %v1030_v7 = vpack.c.b16 %v1015_v43, %v1014_v58  ;;  %2068 = vmatpush.bf16.msra.mxu0 %v3100_v5  ;;  %v3109_v26 = vld [vmem:[#allocation7 + $0x238] sm:$0xff]  ;;  %v3107_v43 = vld [vmem:[#allocation7 + $0x228] sm:$0xff] }
 0x18e   : > { %2026 = vmatmul.bf16.vlgmr.msrb.gmra.mxu0 %v1805_v25  ;;  %1632 = vmatpush.bf16.msrb.mxu1 %v3041_v37  ;;  %v3108_v25 = vld [vmem:[#allocation7 + $0x230] sm:$0xff]  ;;  %v3097_v58 = vld [vmem:[#allocation7 + $0x1d8] sm:$0xff] }
 0x18f   : > { %3215 = vmatpush.bf16.msra.mxu2 %v3109_v26 }
 0x191   : > { %2069 = vmatpush.bf16.msra.mxu0 %v3099_v6 }
 0x192   : > { %1633 = vmatpush.bf16.msrb.mxu1 %v3040_v2  ;;  %v3106_v2 = vld [vmem:[#allocation7 + $0x220] sm:$0xff] }
 0x193   : > { %v4199_v20 = vpop.f32.mrf.mxu2  ;;  %3216 = vmatpush.bf16.msra.mxu2 %v3108_v25 }
 0x195   : > { %1734 = vmatmul.bf16.vlgmr.msrb.gmra.mxu3 %v1030_v7  ;;  %2070 = vmatpush.bf16.msra.mxu0 %v3098_v29 }
 0x196   : > { %1634 = vmatpush.bf16.msrb.mxu1 %v3039_v36  ;;  %v3096_v36 = vld [vmem:[#allocation7 + $0x1d0] sm:$0xff] }
 0x197   : > { %3217 = vmatpush.bf16.msra.mxu2 %v3107_v43 }
 0x198   : > { %1690 = vmatmul.bf16.gmra.mxu2 %v3900_v1  ;;  %v4215_v34 = vpop.f32.mrf.mxu3 }
 0x199   : > { %2071 = vmatpush.bf16.msra.mxu0 %v3097_v58 }
 0x19a   : > { %1635 = vmatpush.bf16.msrb.mxu1 %v3038_v30  ;;  %v3105_v30 = vld [vmem:[#allocation7 + $0x218] sm:$0xff] }
 0x19b   : > { %v4203_v31 = vpop.f32.mrf.mxu2  ;;  %3218 = vmatpush.bf16.msra.mxu2 %v3106_v2 }
 0x19d   : > { %1355 = vmatmul.bf16.gmra.mxu1 %v3963_v19  ;;  %2072 = vmatpush.bf16.msra.mxu0 %v3096_v36 }
 0x19e   : > { %2031 = vmatmul.bf16.gmra.mxu0 %v3963_v19  ;;  %3207 = vmatpush.bf16.msra.mxu1 %v3101_v16 }
 0x19f   : > { %3219 = vmatpush.bf16.msra.mxu2 %v3105_v30 }
 0x1a0   : > { %v4221_v4 = vpop.f32.mrf.mxu3 }
 0x1a1   : > { %2073 = vmatpush.bf16.msra.mxu0 %v3095_v22 }
 0x1a2   : > { %3208 = vmatpush.bf16.msra.mxu1 %v3100_v5  ;;  %v3094_v5 = vld [vmem:[#allocation7 + $0x1c0] sm:$0xff] }
 0x1a3   : > { %v4207_v1 = vpop.f32.mrf.mxu2  ;;  %3220 = vmatpush.bf16.msra.mxu2 %v3104_v21 }
 0x1a5   : > { %1739 = vmatmul.bf16.gmra.mxu3 %v3929_v23  ;;  %2074 = vmatpush.bf16.msra.mxu0 %v3094_v5 }
 0x1a6   : > { %3209 = vmatpush.bf16.msra.mxu1 %v3099_v6  ;;  %v3102_v6 = vld [vmem:[#allocation7 + $0x200] sm:$0xff] }
 0x1a7   : > { %3221 = vmatpush.bf16.msra.mxu2 %v3103_v48 }
 0x1a8   : > { %1695 = vmatmul.bf16.gmra.mxu2 %v3936_v35  ;;  %v4227_v37 = vpop.f32.mrf.mxu3 }
 0x1a9   : > { %2116 = vmatpush.bf16.msrb.mxu0 %v3109_v26 }
 0x1aa   : > { %3210 = vmatpush.bf16.msra.mxu1 %v3098_v29 }
 0x1ab   : > { %v4212_v23 = vpop.f32.mrf.mxu2  ;;  %3222 = vmatpush.bf16.msra.mxu2 %v3102_v6 }
 0x1ad   : > { %1360 = vmatmul.bf16.gmra.mxu1 %v3983_v3  ;;  %2117 = vmatpush.bf16.msrb.mxu0 %v3108_v25 }
 0x1ae   : > { %2036 = vmatmul.bf16.gmra.mxu0 %v3983_v3  ;;  %3211 = vmatpush.bf16.msra.mxu1 %v3097_v58 }
 0x1b0   : > { %v4233_v9 = vpop.f32.mrf.mxu3 }
 0x1b1   : > { %2118 = vmatpush.bf16.msrb.mxu0 %v3107_v43 }
 0x1b2   : > { %3212 = vmatpush.bf16.msra.mxu1 %v3096_v36 }
 0x1b3   : > { %v4218_v59 = vpop.f32.mrf.mxu2 }
 0x1b5   : > { %1744 = vmatmul.bf16.gmra.mxu3 %v3954_v0  ;;  %2119 = vmatpush.bf16.msrb.mxu0 %v3106_v2 }
 0x1b6   : > { %3213 = vmatpush.bf16.msra.mxu1 %v3095_v22 }
 0x1b8   : > { %1700 = vmatmul.bf16.gmra.mxu2 %v3960_v15  ;;  %v4240_v29 = vpop.f32.mrf.mxu3 }
 0x1b9   : > { %2120 = vmatpush.bf16.msrb.mxu0 %v3105_v30 }
 0x1ba   : > { %3214 = vmatpush.bf16.msra.mxu1 %v3094_v5 }
 0x1bb   : > { %v4225_v7 = vpop.f32.mrf.mxu2 }
 0x1bd   : > { %1365 = vmatmul.bf16.gmra.mxu1 %v4005_v61  ;;  %2121 = vmatpush.bf16.msrb.mxu0 %v3104_v21  ;;  %v4724_v21 = vrot.slane %v3873_v46, 7 }
 0x1be   : > { %2041 = vmatmul.bf16.gmra.mxu0 %v4005_v61 }
 0x1c0   : > { %v4247_v25 = vpop.f32.mrf.mxu3 }
 0x1c1   : > { %2122 = vmatpush.bf16.msrb.mxu0 %v3103_v48  ;;  %v786_v48 = vsel %vm772_vm2, %v4724_v21, %v4092_v57 }
 0x1c2   : > { %v791_v2 = vmul.f32 %v3860_v28, %v786_v48 }
 0x1c3   : > { %v4231_v16 = vpop.f32.mrf.mxu2 }
 0x1c4   : > { %v807_v55 = vpack.c.bf16 %v791_v2, %v791_v2 }
 0x1c5   : > { %1749 = vmatmul.bf16.gmra.mxu3 %v3974_v45  ;;  %2123 = vmatpush.bf16.msrb.mxu0 %v3102_v6 }
 0x1c8   : > { %1705 = vmatmul.bf16.gmra.mxu2 %v3980_v60  ;;  %v4255_v43 = vpop.f32.mrf.mxu3 }
 0x1cb   : > { %v4238_v56 = vpop.f32.mrf.mxu2 }
 0x1cd   : > { %1370 = vmatmul.bf16.gmra.mxu1 %v4029_v18 }
 0x1ce   : > { %2046 = vmatmul.bf16.gmra.mxu0 %v4029_v18 }
 0x1d0   : > { %v4273_v5 = vpop.f32.mrf.mxu3 }
 0x1d3   : > { %v4245_v26 = vpop.f32.mrf.mxu2 }
 0x1d5   : > { %1754 = vmatmul.bf16.gmra.mxu3 %v3994_v33 }
 0x1d8   : > { %1710 = vmatmul.bf16.gmra.mxu2 %v4000_v52 }
 0x1db   : > { %v4251_v58 = vpop.f32.mrf.mxu2 }
 0x1dd   : > { %1375 = vmatmul.bf16.gmra.mxu1 %v4066_v50 }
 0x1de   : > { %2051 = vmatmul.bf16.gmra.mxu0 %v4066_v50 }
 0x1e3   : > { %v4271_v30 = vpop.f32.mrf.mxu2 }
 0x1e5   : > { %1759 = vmatmul.bf16.gmra.mxu3 %v4020_v38 }
 0x1e8   : > { %1715 = vmatmul.bf16.gmra.mxu2 %v4026_v10 }
 0x1eb   : > { %v4284_v57 = vpop.f32.mrf.mxu2 }
 0x1ed   : > { %1380 = vmatmul.bf16.gmra.mxu1 %v4130_v49 }
 0x1ee   : > { %2056 = vmatmul.bf16.gmra.mxu0 %v4130_v49  ;;  %v4723_v49 = vpack.c.b16 %v4178_v53, %v4176_v17 }
 0x1f3   : > { %v4291_v12 = vpop.f32.mrf.mxu2 }
 0x1f5   : > { %1764 = vmatmul.bf16.gmra.mxu3 %v4041_v11 }
 0x1f8   : > { %1720 = vmatmul.bf16.gmra.mxu2 %v4060_v47 }
 0x1fa   : > { %v4253_v22 = vpop.f32.mrf.mxu1 }
 0x1fb   : > { %v4304_v6 = vpop.f32.mrf.mxu2 }
 0x1fc   : > { %4727 = vst [vmem:[#allocation25_spill] sm:$0xff] %v4304_v6 }
 0x1fd   : > { %1636 = vmatmul.bf16.vlgmr.msrb.gmra.mxu1 %v934_v62  ;;  %v920_v62 = vunpack.c.l.b16 %v807_v55 }
 0x1fe   : > { %2061 = vmatmul.bf16.gmra.mxu0 %v4723_v49 }
 0x1ff   : > { %v935_v28 = vpack.c.b16 %v4122_v42, %v920_v62  ;;  %v1786_v42 = vpack.c.bf16 %v4126_v41, %v4126_v41 }
 0x201   : > { %v4308_v21 = vunpack.c.l.b16 %v1786_v42 }
 0x202   : > { %v4269_v36 = vpop.f32.mrf.mxu1 }
 0x203   : > { %4728 = vst [vmem:[#allocation26_spill] sm:$0xff] %v4308_v21 }
 0x205   : > { %1769 = vmatmul.bf16.gmra.mxu3 %v4725_v54 }
 0x208   : > { %2129 = vmatmul.bf16.vlgmr.msra.gmra.mxu2 %v3974_v45 }
 0x20a   : > { %v4279_v46 = vpop.f32.mrf.mxu1 }
 0x20b   : > { %v4281_v24 = vpop.f32.mrf.mxu0 }
 0x20d   : > { %1641 = vmatmul.bf16.gmra.mxu1 %v935_v28 }
 0x20e   : > { %2075 = vmatmul.bf16.vlgmr.msra.gmra.mxu0 %v3936_v35  ;;  %v1787_v35 = vpack.c.bf16 %v4151_v63, %v4151_v63  ;;  %v4321_v63 = vpop.f32.mrf.mxu2 }
 0x20f   : > { %4731 = vst [vmem:[#allocation29_spill] sm:$0xff] %v4321_v63 }
 0x212   : > { %v4287_v17 = vpop.f32.mrf.mxu1 }
 0x213   : > { %v4289_v53 = vpop.f32.mrf.mxu0 }
 0x216   : > { %v4328_v55 = vpop.f32.mrf.mxu2 }
 0x218   : > { %2134 = vmatmul.bf16.gmra.mxu2 %v3994_v33  ;;  %v4310_v33 = vunpack.c.l.b16 %v1787_v35 }
 0x21a   : > { %v4294_v45 = vpop.f32.mrf.mxu1 }
 0x21b   : > { %v4296_v14 = vpop.f32.mrf.mxu0 }
 0x21c   : > { %4726 = vst [vmem:[#allocation24_spill] sm:$0xff] %v4296_v14 }
 0x21d   : > { %1646 = vmatmul.bf16.gmra.mxu1 %v3942_v39 }
 0x21e   : > { %2124 = vmatmul.bf16.vlgmr.msrb.gmra.mxu0 %v3954_v0 }
 0x222   : > { %v4306_v49 = vpop.f32.mrf.mxu1 }
 0x223   : > { %v4312_v48 = vpop.f32.mrf.mxu0 }
 0x224   : > { %4729 = vst [vmem:[#allocation27_spill] sm:$0xff] %v4312_v48 }
 0x228   : > { %2139 = vmatmul.bf16.gmra.mxu2 %v4020_v38  ;;  %v4336_v38 = vpop.f32.mrf.mxu2 }
 0x22a   : > { %v4317_v0 = vpop.f32.mrf.mxu1 }
 0x22b   : > { %v4319_v41 = vpop.f32.mrf.mxu0 }
 0x22c   : > { %4730 = vst [vmem:[#allocation28_spill] sm:$0xff] %v4319_v41 }
 0x22d   : > { %1651 = vmatmul.bf16.gmra.mxu1 %v3963_v19  ;;  %v4343_v19 = vpop.f32.mrf.mxu3 }
 0x230   : > { %v4345_v39 = vpop.f32.mrf.mxu2 }
 0x231   : > { %4735 = vst [vmem:[#allocation33_spill] sm:$0xff] %v4345_v39 }
 0x232   : > { %v4324_v2 = vpop.f32.mrf.mxu1 }
 0x233   : > { %v4326_v54 = vpop.f32.mrf.mxu0 }
 0x234   : > { %4732 = vst [vmem:[#allocation30_spill] sm:$0xff] %v4326_v54 }
 0x238   : > { %2144 = vmatmul.bf16.gmra.mxu2 %v4041_v11  ;;  %v4358_v48 = vpop.f32.mrf.mxu2 }
 0x239   : > { %4738 = vst [vmem:[#allocation36_spill] sm:$0xff] %v4358_v48 }
 0x23a   : > { %v4331_v62 = vpop.f32.mrf.mxu1 }
 0x23b   : > { %v4333_v28 = vpop.f32.mrf.mxu0 }
 0x23c   : > { %4733 = vst [vmem:[#allocation31_spill] sm:$0xff] %v4333_v28 }
 0x23d   : > { %1656 = vmatmul.bf16.gmra.mxu1 %v3983_v3  ;;  %v4354_v3 = vpop.f32.mrf.mxu3 }
 0x242   : > { %v4338_v42 = vpop.f32.mrf.mxu1 }
 0x243   : > { %v4340_v35 = vpop.f32.mrf.mxu0 }
 0x244   : > { %4734 = vst [vmem:[#allocation32_spill] sm:$0xff] %v4340_v35 }
 0x245   : > { %v4367_v14 = vpop.f32.mrf.mxu3 }
 0x248   : > { %2149 = vmatmul.bf16.gmra.mxu2 %v4101_v44  ;;  %v4739_v44 = vpack.c.b16 %v4153_v32, %v4146_v51  ;;  %v4744_v51 = vpack.c.b16 %v4188_v8, %v4180_v13  ;;  %v3115_v13 = vld [vmem:[#allocation8 + $0x28] sm:$0xff] }
 0x24a   : > { %v4347_v54 = vpop.f32.mrf.mxu1 }
 0x24b   : > { %v4349_v11 = vpop.f32.mrf.mxu0 }
 0x24c   : > { %4736 = vst [vmem:[#allocation34_spill] sm:$0xff] %v4349_v11 }
 0x24d   : > { %1661 = vmatmul.bf16.gmra.mxu1 %v4005_v61  ;;  %v4370_v61 = vpop.f32.mrf.mxu2 }
 0x24e   : > { %4741 = vst [vmem:[#allocation38_spill] sm:$0xff] %v4370_v61  ;;  %v3116_v61 = vld [vmem:[#allocation8 + $0x30] sm:$0xff] }
 0x252   : > { %v4352_v28 = vpop.f32.mrf.mxu1 }
 0x253   : > { %v4356_v41 = vpop.f32.mrf.mxu0 }
 0x254   : > { %4737 = vst [vmem:[#allocation35_spill] sm:$0xff] %v4356_v41  ;;  %v4376_v41 = vpop.f32.mrf.mxu3 }
 0x255   : > { %v4378_v48 = vpop.f32.mrf.mxu2 }
 0x256   : > { %4743 = vst [vmem:[#allocation40_spill] sm:$0xff] %v4378_v48  ;;  %v3113_v48 = vld [vmem:[#allocation8 + $0x18] sm:$0xff] }
 0x258   : > { %2154 = vmatmul.bf16.gmra.mxu2 %v4739_v44 }
 0x25a   : > { %v4363_v35 = vpop.f32.mrf.mxu1 }
 0x25b   : > { %v4365_v39 = vpop.f32.mrf.mxu0 }
 0x25c   : > { %4740 = vst [vmem:[#allocation37_spill] sm:$0xff] %v4365_v39  ;;  %v4388_v39 = vpop.f32.mrf.mxu3 }
 0x25d   : > { %1666 = vmatmul.bf16.gmra.mxu1 %v4029_v18  ;;  %v3117_v18 = vld [vmem:[#allocation8 + $0x38] sm:$0xff] }
 0x25e   : > { %2329 = vmatpush.bf16.msra.mxu0 %v3117_v18  ;;  %3223 = vmatpush.bf16.msra.mxu3 %v3117_v18  ;;  %v4399_v18 = vpop.f32.mrf.mxu2 }
 0x25f   : > { %4751 = vst [vmem:[#allocation47_spill] sm:$0xff] %v4399_v18 }
 0x262   : > { %v4372_v11 = vpop.f32.mrf.mxu1  ;;  %2330 = vmatpush.bf16.msra.mxu0 %v3116_v61  ;;  %3224 = vmatpush.bf16.msra.mxu3 %v3116_v61  ;;  %v3112_v61 = vld [vmem:[#allocation8 + $0x10] sm:$0xff] }
 0x263   : > { %v4374_v63 = vpop.f32.mrf.mxu0 }
 0x264   : > { %4742 = vst [vmem:[#allocation39_spill] sm:$0xff] %v4374_v63 }
 0x266   : > { %2331 = vmatpush.bf16.msra.mxu0 %v3115_v13  ;;  %3225 = vmatpush.bf16.msra.mxu3 %v3115_v13 }
 0x268   : > { %2159 = vmatmul.bf16.gmra.mxu2 %v4744_v51  ;;  %v3114_v51 = vld [vmem:[#allocation8 + $0x20] sm:$0xff] }
 0x26a   : > { %v4383_v32 = vpop.f32.mrf.mxu1  ;;  %2332 = vmatpush.bf16.msra.mxu0 %v3114_v51  ;;  %3226 = vmatpush.bf16.msra.mxu3 %v3114_v51  ;;  %v4407_v51 = vpop.f32.mrf.mxu2 }
 0x26b   : > { %4745 = vst [vmem:[#allocation41_spill] sm:$0xff] %v4383_v32  ;;  %v4385_v44 = vpop.f32.mrf.mxu0  ;;  %v3111_v32 = vld [vmem:[#allocation8 + $0x8] sm:$0xff] }
 0x26c   : > { %4746 = vst [vmem:[#allocation42_spill] sm:$0xff] %v4385_v44  ;;  %v4394_v44 = vpop.f32.mrf.mxu3 }
 0x26d   : > { %1671 = vmatmul.bf16.gmra.mxu1 %v4066_v50  ;;  %4749 = vst [vmem:[#allocation45_spill] sm:$0xff] %v4394_v44 }
 0x26e   : > { %2333 = vmatpush.bf16.msra.mxu0 %v3113_v48  ;;  %3227 = vmatpush.bf16.msra.mxu3 %v3113_v48  ;;  %v3110_v48 = vld [vmem:[#allocation8] sm:$0xff] }
 0x272   : > { %v4390_v63 = vpop.f32.mrf.mxu1  ;;  %2334 = vmatpush.bf16.msra.mxu0 %v3112_v61  ;;  %3228 = vmatpush.bf16.msra.mxu3 %v3112_v61  ;;  %v1403_v61 = vadd.f32 %v4207_v1, %v4287_v17  ;;  %v1398_v1 = vadd.f32 %v4199_v20, %v4269_v36  ;;  %v1408_v20 = vadd.f32 %v4218_v59, %v4306_v49 }
 0x273   : > { %4747 = vst [vmem:[#allocation43_spill] sm:$0xff] %v4390_v63  ;;  %v4392_v6 = vpop.f32.mrf.mxu0 }
 0x274   : > { %4748 = vst [vmem:[#allocation44_spill] sm:$0xff] %v4392_v6  ;;  %v4403_v13 = vpop.f32.mrf.mxu3  ;;  %v1457_v36 = vadd.f32 %v4247_v25, %v1408_v20 }
 0x276   : > { %2335 = vmatpush.bf16.msra.mxu0 %v3111_v32  ;;  %3229 = vmatpush.bf16.msra.mxu3 %v3111_v32  ;;  %v1396_v32 = vadd.f32 %v4194_v40, %v4253_v22  ;;  %v1447_v40 = vadd.f32 %v4221_v4, %v1398_v1 }
 0x27a   : > { %v1637_v8 = vpop.f32.mrf.mxu1  ;;  %2336 = vmatpush.bf16.msra.mxu0 %v3110_v48  ;;  %3230 = vmatpush.bf16.msra.mxu3 %v3110_v48  ;;  %v1406_v48 = vadd.f32 %v4212_v23, %v4294_v45 }
 0x27b   : > { %v4396_v50 = vpop.f32.mrf.mxu0 }
 0x27c   : > { %4750 = vst [vmem:[#allocation46_spill] sm:$0xff] %v4396_v50  ;;  %v1401_v50 = vadd.f32 %v4203_v31, %v4279_v46  ;;  %v4415_v31 = vpop.f32.mrf.mxu3  ;;  %v1452_v46 = vadd.f32 %v4233_v9, %v1403_v61  ;;  %v1455_v9 = vadd.f32 %v4240_v29, %v1406_v48 }
 0x27d   : > { %2080 = vmatmul.bf16.vlgmr.msra.gmra.mxu1 %v3960_v15 }
 0x27e   : > { %v1450_v15 = vadd.f32 %v4227_v37, %v1401_v50  ;;  %v4420_v37 = vpop.f32.mrf.mxu2 }
 0x27f   : > { %4753 = vst [vmem:[#allocation49_spill] sm:$0xff] %v4420_v37 }
 0x282   : > { %v1639_v6 = vpop.f32.mrf.mxu1 }
 0x283   : > { %v4401_v63 = vpop.f32.mrf.mxu0  ;;  %v1640_v23 = vadd.f32 %v1639_v6, %v1447_v40  ;;  %v4446_v6 = vld [vmem:[%s4677_s4] ss:$0 sm:$0xff]  ;;  %v1413_v40 = vadd.f32 %v4231_v16, %v4324_v2 }
 0x284   : > { %4752 = vst [vmem:[#allocation48_spill] sm:$0xff] %v4401_v63  ;;  %v1735_v63 = vpop.f32.mrf.mxu3 }
 0x285   : > { %v1689_v29 = vadd.f32 %v4336_v38, %v1640_v23 }
 0x28a   : > { %v1642_v18 = vpop.f32.mrf.mxu1 }
 0x28b   : > { %v4410_v44 = vadd.f32 %v1642_v18, %v1450_v15  ;;  %v2076_v21 = vpop.f32.mrf.mxu0 }
 0x28c   : > { %v2077_v45 = vadd.f32 %v2076_v21, %v4281_v24  ;;  %v1737_v21 = vpop.f32.mrf.mxu3 }
 0x28d   : > { %2085 = vmatmul.bf16.gmra.mxu1 %v3980_v60  ;;  %v1445_v60 = vadd.f32 %v4215_v34, %v1396_v32 }
 0x28f   : > { %v1638_v17 = vadd.f32 %v1637_v8, %v1445_v60 }
 0x291   : > { %v1687_v37 = vadd.f32 %v4328_v55, %v1638_v17 }
 0x292   : > { %v1644_v50 = vpop.f32.mrf.mxu1 }
 0x293   : > { %v4422_v18 = vadd.f32 %v1644_v50, %v1452_v46  ;;  %v2078_v15 = vpop.f32.mrf.mxu0  ;;  %v4433_v50 = vpop.f32.mrf.mxu2  ;;  %v1736_v4 = vadd.f32 %v1735_v63, %v1687_v37  ;;  %v1411_v63 = vadd.f32 %v4225_v7, %v4317_v0  ;;  %v1462_v0 = vadd.f32 %v4273_v5, %v1413_v40 }
 0x294   : > { %v2079_v8 = vadd.f32 %v2078_v15, %v4289_v53 }
 0x295   : > { %v1460_v15 = vadd.f32 %v4255_v43, %v1411_v63  ;;  %v1416_v43 = vadd.f32 %v4238_v56, %v4331_v62  ;;  %v1421_v56 = vadd.f32 %v4251_v58, %v4347_v54  ;;  %v1426_v58 = vadd.f32 %v4284_v57, %v4363_v35  ;;  %v4757_v35 = vld [vmem:[#allocation41_spill] sm:$0xff] }
 0x297   : > { %v1465_v23 = vadd.f32 %v4343_v19, %v1416_v43  ;;  %v1470_v62 = vadd.f32 %v4367_v14, %v1421_v56  ;;  %v1475_v14 = vadd.f32 %v4388_v39, %v1426_v58  ;;  %v4763_v56 = vld [vmem:[#allocation36_spill] sm:$0xff] }
 0x29a   : > { %v1647_v22 = vpop.f32.mrf.mxu1 }
 0x29b   : > { %v4431_v61 = vadd.f32 %v1647_v22, %v1455_v9  ;;  %v2125_v46 = vpop.f32.mrf.mxu0  ;;  %v4452_v38 = vpop.f32.mrf.mxu2 }
 0x29c   : > { %v2126_v34 = vadd.f32 %v2125_v46, %v2077_v45 }
 0x29d   : > { %2090 = vmatmul.bf16.gmra.mxu1 %v4000_v52  ;;  %v1738_v52 = vadd.f32 %v1737_v21, %v1689_v29 }
 0x29e   : > { %v2165_v32 = vadd.f32 %v2126_v34, %v1736_v4 }
 0x2a0   : > { %v2185_v25 = vadd.f32 %v4446_v6, %v2165_v32 }
 0x2a2   : > { %v1649_v24 = vpop.f32.mrf.mxu1  ;;  %v2201_v48 = vmax.f32 %v2185_v25, 0.0 }
 0x2a3   : > { %v4448_v55 = vadd.f32 %v1649_v24, %v1457_v36  ;;  %v2127_v59 = vpop.f32.mrf.mxu0  ;;  %v4462_v7 = vpop.f32.mrf.mxu2  ;;  %v4756_v24 = vld [vmem:[#allocation45_spill] sm:$0xff] }
 0x2a4   : > { %v2128_v49 = vadd.f32 %v2127_v59, %v2079_v8 }
 0x2a6   : > { %v2166_v53 = vadd.f32 %v2128_v49, %v1738_v52  ;;  %v4758_v49 = vld [vmem:[#allocation25_spill] sm:$0xff] }
 0x2a7   : > { %v1431_v39 = vadd.f32 %v4758_v49, %v4757_v35 }
 0x2a8   : > { %v2186_v37 = vadd.f32 %v4446_v6, %v2166_v53 }
 0x2a9   : > { %v1480_v63 = vadd.f32 %v4403_v13, %v1431_v39  ;;  %v4762_v13 = vld [vmem:[#allocation33_spill] sm:$0xff] }
 0x2aa   : > { %v2202_v1 = vmax.f32 %v2186_v37, 0.0  ;;  %v1652_v60 = vpop.f32.mrf.mxu1 }
 0x2ab   : > { %v4457_v17 = vadd.f32 %v1652_v60, %v1460_v15  ;;  %v4470_v45 = vpop.f32.mrf.mxu2 }
 0x2ac   : > { %v2217_v9 = vpack.c.bf16 %v2202_v1, %v2201_v48 }
 0x2ad   : > { %2095 = vmatmul.bf16.gmra.mxu1 %v4026_v10  ;;  %v1418_v10 = vadd.f32 %v4245_v26, %v4338_v42  ;;  %v1423_v26 = vadd.f32 %v4271_v30, %v4352_v28  ;;  %v4754_v30 = vld [vmem:[#allocation26_spill] sm:$0xff] }
 0x2ae   : > { %2337 = vmatmul.bf16.vlgmr.msra.gmra.mxu0 %v2217_v9  ;;  %v4755_v28 = vpack.c.b16 %v4310_v33, %v4754_v30  ;;  %v4760_v33 = vld [vmem:[#allocation29_spill] sm:$0xff] }
 0x2af   : > { %v1467_v16 = vadd.f32 %v4354_v3, %v1418_v10  ;;  %v1472_v42 = vadd.f32 %v4376_v41, %v1423_v26  ;;  %v1740_v41 = vpop.f32.mrf.mxu3  ;;  %v4764_v26 = vld [vmem:[#allocation27_spill] sm:$0xff] }
 0x2b2   : > { %v1654_v22 = vpop.f32.mrf.mxu1 }
 0x2b3   : > { %v4465_v46 = vadd.f32 %v1654_v22, %v1462_v0  ;;  %v4480_v29 = vpop.f32.mrf.mxu2  ;;  %v4761_v22 = vld [vmem:[#allocation24_spill] sm:$0xff] }
 0x2b7   : > { %v1742_v53 = vpop.f32.mrf.mxu3 }
 0x2ba   : > { %v1657_v20 = vpop.f32.mrf.mxu1 }
 0x2bb   : > { %v4472_v34 = vadd.f32 %v1657_v20, %v1465_v23  ;;  %v1692_v23 = vadd.f32 %v4762_v13, %v4410_v44 }
 0x2bd   : > { %2100 = vmatmul.bf16.gmra.mxu1 %v4060_v47  ;;  %v4490_v47 = vpop.f32.mrf.mxu2 }
 0x2bf   : > { %v1745_v9 = vpop.f32.mrf.mxu3 }
 0x2c2   : > { %v1659_v5 = vpop.f32.mrf.mxu1 }
 0x2c3   : > { %v4478_v2 = vadd.f32 %v1659_v5, %v1467_v16  ;;  %v1741_v5 = vadd.f32 %v1740_v41, %v1692_v23  ;;  %v4765_v41 = vld [vmem:[#allocation28_spill] sm:$0xff] }
 0x2c5   : > { %v4497_v54 = vpop.f32.mrf.mxu2 }
 0x2c7   : > { %v1747_v20 = vpop.f32.mrf.mxu3 }
 0x2ca   : > { %v1662_v19 = vpop.f32.mrf.mxu1 }
 0x2cb   : > { %v4485_v4 = vadd.f32 %v1662_v19, %v1470_v62  ;;  %v1694_v62 = vadd.f32 %v4763_v56, %v4422_v18  ;;  %v4766_v18 = vld [vmem:[#allocation38_spill] sm:$0xff] }
 0x2cd   : > { %2105 = vmatmul.bf16.gmra.mxu1 %v4114_v27  ;;  %v1428_v27 = vadd.f32 %v4291_v12, %v4372_v11  ;;  %v2130_v59 = vpop.f32.mrf.mxu2  ;;  %v4759_v11 = vld [vmem:[#allocation43_spill] sm:$0xff] }
 0x2ce   : > { %v1433_v15 = vadd.f32 %v4760_v33, %v4759_v11  ;;  %v4768_v33 = vld [vmem:[#allocation30_spill] sm:$0xff] }
 0x2cf   : > { %v1477_v21 = vadd.f32 %v4756_v24, %v1428_v27  ;;  %v1750_v27 = vpop.f32.mrf.mxu3 }
 0x2d0   : > { %v1482_v48 = vadd.f32 %v4415_v31, %v1433_v15 }
 0x2d2   : > { %v1664_v3 = vpop.f32.mrf.mxu1 }
 0x2d3   : > { %v4493_v36 = vadd.f32 %v1664_v3, %v1472_v42  ;;  %v1743_v3 = vadd.f32 %v1742_v53, %v1694_v62 }
 0x2d5   : > { %v2132_v12 = vpop.f32.mrf.mxu2 }
 0x2da   : > { %v1667_v8 = vpop.f32.mrf.mxu1 }
 0x2db   : > { %v4500_v32 = vadd.f32 %v1667_v8, %v1475_v14 }
 0x2dd   : > { %2110 = vmatmul.bf16.gmra.mxu1 %v4755_v28  ;;  %v2135_v40 = vpop.f32.mrf.mxu2 }
 0x2e2   : > { %v1669_v52 = vpop.f32.mrf.mxu1 }
 0x2e3   : > { %v4508_v57 = vadd.f32 %v1669_v52, %v1477_v21  ;;  %v1697_v52 = vadd.f32 %v4766_v18, %v4431_v61 }
 0x2e5   : > { %v2137_v16 = vpop.f32.mrf.mxu2  ;;  %v1746_v39 = vadd.f32 %v1745_v9, %v1697_v52  ;;  %v4773_v52 = vld [vmem:[#allocation49_spill] sm:$0xff] }
 0x2ea   : > { %v1672_v25 = vpop.f32.mrf.mxu1 }
 0x2eb   : > { %v4513_v37 = vadd.f32 %v1672_v25, %v1480_v63  ;;  %v4767_v63 = vld [vmem:[#allocation40_spill] sm:$0xff] }
 0x2ec   : > { %v1699_v25 = vadd.f32 %v4767_v63, %v4448_v55  ;;  %v4770_v55 = vld [vmem:[#allocation47_spill] sm:$0xff] }
 0x2ed   : > { %v2140_v44 = vpop.f32.mrf.mxu2  ;;  %v1702_v56 = vadd.f32 %v4770_v55, %v4457_v17 }
 0x2f2   : > { %v1674_v1 = vpop.f32.mrf.mxu1 }
 0x2f3   : > { %v4518_v60 = vadd.f32 %v1674_v1, %v1482_v48  ;;  %v1748_v1 = vadd.f32 %v1747_v20, %v1699_v25  ;;  %v1751_v20 = vadd.f32 %v1750_v27, %v1702_v56 }
 0x2f5   : > { %v2142_v48 = vpop.f32.mrf.mxu2 }
 0x2fa   : > { %v2081_v0 = vpop.f32.mrf.mxu1 }
 0x2fb   : > { %v2082_v43 = vadd.f32 %v2081_v0, %v4761_v22 }
 0x2fd   : > { %v2131_v10 = vadd.f32 %v2130_v59, %v2082_v43 }
 0x2ff   : > { %v2167_v31 = vadd.f32 %v2131_v10, %v1741_v5 }
 0x301   : > { %v2187_v14 = vadd.f32 %v4446_v6, %v2167_v31 }
 0x302   : > { %v2083_v19 = vpop.f32.mrf.mxu1 }
 0x303   : > { %v2084_v42 = vadd.f32 %v2083_v19, %v4764_v26  ;;  %v2203_v24 = vmax.f32 %v2187_v14, 0.0  ;;  %v2145_v19 = vpop.f32.mrf.mxu2 }
 0x305   : > { %v2133_v58 = vadd.f32 %v2132_v12, %v2084_v42  ;;  %v1752_v12 = vpop.f32.mrf.mxu3 }
 0x307   : > { %v2168_v8 = vadd.f32 %v2133_v58, %v1743_v3  ;;  %v4771_v3 = vld [vmem:[#allocation32_spill] sm:$0xff] }
 0x309   : > { %v2188_v30 = vadd.f32 %v4446_v6, %v2168_v8 }
 0x30a   : > { %v2086_v28 = vpop.f32.mrf.mxu1 }
 0x30b   : > { %v2204_v21 = vmax.f32 %v2188_v30, 0.0  ;;  %v2087_v59 = vadd.f32 %v2086_v28, %v4765_v41  ;;  %v2147_v17 = vpop.f32.mrf.mxu2  ;;  %v4772_v41 = vld [vmem:[#allocation34_spill] sm:$0xff] }
 0x30d   : > { %v2218_v35 = vpack.c.bf16 %v2204_v21, %v2203_v24  ;;  %v2136_v49 = vadd.f32 %v2135_v40, %v2087_v59  ;;  %v4769_v40 = vld [vmem:[#allocation31_spill] sm:$0xff]  ;;  %v1755_v5 = vpop.f32.mrf.mxu3 }
 0x30f   : > { %2342 = vmatmul.bf16.vlgmr.msra.gmra.mxu3 %v2218_v35  ;;  %v2169_v11 = vadd.f32 %v2136_v49, %v1746_v39  ;;  %v1707_v35 = vadd.f32 %v4773_v52, %v4472_v34  ;;  %v3192_v49 = vld [vmem:[%s3846_s8 + $0x8] sm:$0xff]   ;;  %v4778_v52 = vld [vmem:[#allocation42_spill] sm:$0xff] }
 0x310   : > { %v3122_v25 = vunpack.c.l.bf16 %v3192_v49 }
 0x311   : > { %v2189_v43 = vadd.f32 %v4446_v6, %v2169_v11  ;;  %v1756_v11 = vadd.f32 %v1755_v5, %v1707_v35 }
 0x312   : > { %v2088_v53 = vpop.f32.mrf.mxu1 }
 0x313   : > { %v2089_v15 = vadd.f32 %v2088_v53, %v4768_v33  ;;  %v2205_v9 = vmax.f32 %v2189_v43, 0.0  ;;  %v1709_v33 = vadd.f32 %v4433_v50, %v4478_v2 }
 0x315   : > { %v2138_v0 = vadd.f32 %v2137_v16, %v2089_v15  ;;  %v1704_v16 = vadd.f32 %v4407_v51, %v4465_v46  ;;  %v1757_v30 = vpop.f32.mrf.mxu3  ;;  %v4548_v46 = vld [vmem:[%s4679_s6] ss:$0 sm:$0xff]  ;;  %v2150_v15 = vpop.f32.mrf.mxu2 }
 0x317   : > { %v2170_v22 = vadd.f32 %v2138_v0, %v1748_v1  ;;  %v1753_v14 = vadd.f32 %v1752_v12, %v1704_v16  ;;  %v3123_v1 = vunpack.c.h.bf16 %v3192_v49 }
 0x319   : > { %v2190_v61 = vadd.f32 %v4446_v6, %v2170_v22  ;;  %v4775_v22 = vld [vmem:[#allocation35_spill] sm:$0xff] }
 0x31a   : > { %v2091_v13 = vpop.f32.mrf.mxu1 }
 0x31b   : > { %v2092_v23 = vadd.f32 %v2091_v13, %v4769_v40  ;;  %v2206_v10 = vmax.f32 %v2190_v61, 0.0  ;;  %v1758_v40 = vadd.f32 %v1757_v30, %v1709_v33  ;;  %v1714_v30 = vadd.f32 %v4462_v7, %v4493_v36 }
 0x31c   : > { %v1717_v7 = vadd.f32 %v4470_v45, %v4500_v32 }
 0x31d   : > { %v2219_v62 = vpack.c.bf16 %v2206_v10, %v2205_v9  ;;  %v2141_v31 = vadd.f32 %v2140_v44, %v2092_v23  ;;  %v1760_v12 = vpop.f32.mrf.mxu3 }
 0x31f   : > { %2347 = vmatmul.bf16.gmra.mxu3 %v2219_v62  ;;  %v2171_v42 = vadd.f32 %v2141_v31, %v1751_v20  ;;  %v4776_v31 = vld [vmem:[#allocation37_spill] sm:$0xff] }
 0x321   : > { %v2191_v24 = vadd.f32 %v4446_v6, %v2171_v42  ;;  %v2152_v42 = vpop.f32.mrf.mxu2 }
 0x322   : > { %v2093_v26 = vpop.f32.mrf.mxu1 }
 0x323   : > { %v2094_v58 = vadd.f32 %v2093_v26, %v4771_v3  ;;  %v2207_v18 = vmax.f32 %v2191_v24, 0.0  ;;  %v1712_v3 = vadd.f32 %v4452_v38, %v4485_v4 }
 0x325   : > { %v2143_v8 = vadd.f32 %v2142_v48, %v2094_v58 }
 0x327   : > { %v2172_v28 = vadd.f32 %v2143_v8, %v1753_v14  ;;  %v1761_v8 = vadd.f32 %v1760_v12, %v1712_v3 }
 0x329   : > { %v2192_v21 = vadd.f32 %v4446_v6, %v2172_v28 }
 0x32a   : > { %v2096_v44 = vpop.f32.mrf.mxu1 }
 0x32b   : > { %v2097_v27 = vadd.f32 %v2096_v44, %v4772_v41  ;;  %v2338_v59 = vpop.f32.mrf.mxu0  ;;  %v2208_v51 = vmax.f32 %v2192_v21, 0.0 }
 0x32c   : > { %v2339_v53 = vadd.f32 %v4548_v46, %v2338_v59  ;;  %v2155_v59 = vpop.f32.mrf.mxu2 }
 0x32d   : > { %v2220_v39 = vpack.c.bf16 %v2208_v51, %v2207_v18  ;;  %v2146_v63 = vadd.f32 %v2145_v19, %v2097_v27  ;;  %v1762_v19 = vpop.f32.mrf.mxu3 }
 0x32e   : > { %v2378_v61 = vadd.f32 %v3122_v25, %v2339_v53  ;;  %v1763_v41 = vadd.f32 %v1762_v19, %v1714_v30 }
 0x32f   : > { %2352 = vmatmul.bf16.gmra.mxu3 %v2220_v39  ;;  %v2173_v0 = vadd.f32 %v2146_v63, %v1756_v11  ;;  %v1719_v11 = vadd.f32 %v4480_v29, %v4508_v57  ;;  %v1722_v29 = vadd.f32 %v4490_v47, %v4513_v37 }
 0x330   : > { %v2394_v50 = vmax.f32 %v2378_v61, 0.0 }
 0x331   : > { %v2193_v5 = vadd.f32 %v4446_v6, %v2173_v0 }
 0x332   : > { %v2098_v48 = vpop.f32.mrf.mxu1 }
 0x333   : > { %v2099_v43 = vadd.f32 %v2098_v48, %v4775_v22  ;;  %v2340_v34 = vpop.f32.mrf.mxu0  ;;  %v2209_v16 = vmax.f32 %v2193_v5, 0.0  ;;  %v4779_v48 = vld [vmem:[#allocation44_spill] sm:$0xff] }
 0x334   : > { %v2341_v13 = vadd.f32 %v4548_v46, %v2340_v34  ;;  %v2157_v53 = vpop.f32.mrf.mxu2 }
 0x335   : > { %v2148_v23 = vadd.f32 %v2147_v17, %v2099_v43  ;;  %v4777_v17 = vld [vmem:[#allocation39_spill] sm:$0xff]  ;;  %v1765_v44 = vpop.f32.mrf.mxu3 }
 0x336   : > { %v2379_v9 = vadd.f32 %v3123_v1, %v2341_v13  ;;  %v1766_v12 = vadd.f32 %v1765_v44, %v1717_v7 }
 0x337   : > { %v2174_v10 = vadd.f32 %v2148_v23, %v1758_v40  ;;  %v4780_v40 = vld [vmem:[#allocation46_spill] sm:$0xff] }
 0x338   : > { %v2395_v2 = vmax.f32 %v2379_v9, 0.0 }
 0x339   : > { %v2194_v55 = vadd.f32 %v4446_v6, %v2174_v10 }
 0x33a   : > { %v3155_v56 = vpack.c.bf16 %v2395_v2, %v2394_v50  ;;  %v2101_v62 = vpop.f32.mrf.mxu1  ;;  %v1724_v2 = vadd.f32 %v4497_v54, %v4518_v60  ;;  %v3193_v60 = vld [vmem:[%s3846_s8 + $0x10] sm:$0xff]  }
 0x33b   : > { %v2102_v20 = vadd.f32 %v2101_v62, %v4776_v31  ;;  %v2210_v26 = vmax.f32 %v2194_v55, 0.0  ;;  %v4781_v62 = vld [vmem:[#allocation48_spill] sm:$0xff] }
 0x33c   : > { %3156 = vst [vmem:[%s4564_s13] sm:$0xff] %v3155_v56   ;;  %v2160_v32 = vpop.f32.mrf.mxu2 }
 0x33d   : > { %v2221_v58 = vpack.c.bf16 %v2210_v26, %v2209_v16  ;;  %v2151_v14 = vadd.f32 %v2150_v15, %v2102_v20  ;;  %v1767_v63 = vpop.f32.mrf.mxu3 }
 0x33e   : > { %v1768_v0 = vadd.f32 %v1767_v63, %v1719_v11 }
 0x33f   : > { %2357 = vmatmul.bf16.gmra.mxu3 %v2221_v58  ;;  %v2175_v24 = vadd.f32 %v2151_v14, %v1761_v8  ;;  %v3126_v8 = vunpack.c.l.bf16 %v3193_v60 }
 0x341   : > { %v2195_v51 = vadd.f32 %v4446_v6, %v2175_v24 }
 0x342   : > { %v2103_v28 = vpop.f32.mrf.mxu1 }
 0x343   : > { %v2104_v21 = vadd.f32 %v2103_v28, %v4777_v17  ;;  %v2211_v49 = vmax.f32 %v2195_v51, 0.0  ;;  %v3127_v28 = vunpack.c.h.bf16 %v3193_v60 }
 0x344   : > { %v2162_v20 = vpop.f32.mrf.mxu2 }
 0x345   : > { %v2153_v27 = vadd.f32 %v2152_v42, %v2104_v21  ;;  %v1770_v61 = vpop.f32.mrf.mxu3 }
 0x346   : > { %v1771_v50 = vadd.f32 %v1770_v61, %v1722_v29 }
 0x347   : > { %v2176_v18 = vadd.f32 %v2153_v27, %v1763_v41 }
 0x349   : > { %v2196_v38 = vadd.f32 %v4446_v6, %v2176_v18  ;;  %v3194_v18 = vld [vmem:[%s3846_s8 + $0x18] sm:$0xff]  }
 0x34a   : > { %v2106_v4 = vpop.f32.mrf.mxu1  ;;  %v3130_v51 = vunpack.c.l.bf16 %v3194_v18 }
 0x34b   : > { %v2107_v35 = vadd.f32 %v2106_v4, %v4778_v52  ;;  %v2212_v39 = vmax.f32 %v2196_v38, 0.0  ;;  %v3131_v4 = vunpack.c.h.bf16 %v3194_v18 }
 0x34d   : > { %v2222_v36 = vpack.c.bf16 %v2212_v39, %v2211_v49  ;;  %v2156_v25 = vadd.f32 %v2155_v59, %v2107_v35  ;;  %v1772_v31 = vpop.f32.mrf.mxu3 }
 0x34e   : > { %v1773_v16 = vadd.f32 %v1772_v31, %v1724_v2 }
 0x34f   : > { %2362 = vmatmul.bf16.gmra.mxu3 %v2222_v36  ;;  %v2177_v15 = vadd.f32 %v2156_v25, %v1766_v12 }
 0x351   : > { %v2197_v34 = vadd.f32 %v4446_v6, %v2177_v15 }
 0x352   : > { %v2108_v33 = vpop.f32.mrf.mxu1 }
 0x353   : > { %v2109_v1 = vadd.f32 %v2108_v33, %v4779_v48  ;;  %v2213_v9 = vmax.f32 %v2197_v34, 0.0 }
 0x355   : > { %v2158_v22 = vadd.f32 %v2157_v53, %v2109_v1  ;;  %v3195_v53 = vld [vmem:[%s3846_s8 + $0x20] sm:$0xff]  }
 0x356   : > { %v3134_v12 = vunpack.c.l.bf16 %v3195_v53  ;;  %v3135_v33 = vunpack.c.h.bf16 %v3195_v53 }
 0x357   : > { %v2178_v43 = vadd.f32 %v2158_v22, %v1768_v0 }
 0x359   : > { %v2198_v45 = vadd.f32 %v4446_v6, %v2178_v43 }
 0x35a   : > { %v2111_v13 = vpop.f32.mrf.mxu1 }
 0x35b   : > { %v2112_v23 = vadd.f32 %v2111_v13, %v4780_v40  ;;  %v2214_v10 = vmax.f32 %v2198_v45, 0.0  ;;  %v3196_v45 = vld [vmem:[%s3846_s8 + $0x28] sm:$0xff]  }
 0x35c   : > { %v3139_v40 = vunpack.c.h.bf16 %v3196_v45 }
 0x35d   : > { %v2223_v57 = vpack.c.bf16 %v2214_v10, %v2213_v9  ;;  %v2161_v5 = vadd.f32 %v2160_v32, %v2112_v23  ;;  %v3138_v32 = vunpack.c.l.bf16 %v3196_v45 }
 0x35f   : > { %2367 = vmatmul.bf16.gmra.mxu3 %v2223_v57  ;;  %v2179_v56 = vadd.f32 %v2161_v5, %v1771_v50 }
 0x361   : > { %v2199_v3 = vadd.f32 %v4446_v6, %v2179_v56 }
 0x362   : > { %v2113_v55 = vpop.f32.mrf.mxu1 }
 0x363   : > { %v2114_v19 = vadd.f32 %v2113_v55, %v4781_v62  ;;  %v2215_v37 = vmax.f32 %v2199_v3, 0.0  ;;  %v3197_v55 = vld [vmem:[%s3846_s8 + $0x30] sm:$0xff]  }
 0x364   : > { %v3142_v56 = vunpack.c.l.bf16 %v3197_v55 }
 0x365   : > { %v2163_v26 = vadd.f32 %v2162_v20, %v2114_v19  ;;  %v3143_v19 = vunpack.c.h.bf16 %v3197_v55 }
 0x367   : > { %v2180_v42 = vadd.f32 %v2163_v26, %v1773_v16 }
 0x369   : > { %v2200_v47 = vadd.f32 %v4446_v6, %v2180_v42 }
 0x36b   : > { %v2216_v58 = vmax.f32 %v2200_v47, 0.0 }
 0x36d   : > { %v2224_v14 = vpack.c.bf16 %v2216_v58, %v2215_v37  ;;  %v3198_v58 = vld [vmem:[%s3846_s8 + $0x38] sm:$0xff]  }
 0x36e   : > { %v3147_v60 = vunpack.c.h.bf16 %v3198_v58 }
 0x36f   : > { %2372 = vmatmul.bf16.gmra.mxu3 %v2224_v14  ;;  %v3146_v14 = vunpack.c.l.bf16 %v3198_v58 }
 0x392   : > { %v2343_v54 = vpop.f32.mrf.mxu3 }
 0x393   : > { %v2344_v30 = vadd.f32 %v4548_v46, %v2343_v54 }
 0x395   : > { %v2380_v17 = vadd.f32 %v3126_v8, %v2344_v30 }
 0x397   : > { %v2396_v41 = vmax.f32 %v2380_v17, 0.0 }
 0x39a   : > { %v2345_v24 = vpop.f32.mrf.mxu3 }
 0x39b   : > { %v2346_v21 = vadd.f32 %v4548_v46, %v2345_v24 }
 0x39d   : > { %v2381_v44 = vadd.f32 %v3127_v28, %v2346_v21 }
 0x39f   : > { %v2397_v27 = vmax.f32 %v2381_v44, 0.0 }
 0x3a1   : > { %v3160_v6 = vpack.c.bf16 %v2397_v27, %v2396_v41  ;;  %v3199_v27 = vld [vmem:[%s3846_s8 + $0x40] sm:$0xff]   ;;  %s2460_s8 = sshll.u32 %s2457_s15, 4  ;;  %s2461_s8 = int_to_ptr.hbm [resolvable:$true] %s2460_s8 }
 0x3a2   : > { %v2348_v59 = vpop.f32.mrf.mxu3  ;;  %v3151_v18 = vunpack.c.h.bf16 %v3199_v27  ;;  %s3509_s23 = sshra.s32 %s2461_s8, 4  ;;  %s3510_s23 = int_to_ptr.hbm [resolvable:$true] %s3509_s23 }
 0x3a3   : > { %3200 = vst [vmem:[%s4564_s13 + $0x8] sm:$0xff] %v3160_v6   ;;  %v2349_v38 = vadd.f32 %v4548_v46, %v2348_v59  ;;  %v3150_v6 = vunpack.c.l.bf16 %v3199_v27  ;;  %s3511_s22 = scalar_lea.hbm %s3510_s23, 64  ;;  %p3516_p3 = scmp.lt.s32.totalorder %s3510_s23, %s4784_s14 }
 0x3a4   : > { %p3512_p11 = scmp.ne.s32.totalorder %s3510_s23, %s3511_s22  ;;  %p3517_p5 = scmp.lt.s32.totalorder %s3515_s21, %s3511_s22 }
 0x3a5   : > { %v2382_v35 = vadd.f32 %v3130_v51, %v2349_v38 }
 0x3a6   : > { %p3513_p0 = pnand %p3512_p11, %p3745_p6  ;;  %p3518_p7 = por %p3517_p5, %p3516_p3 }
 0x3a7   : > { %v2398_v7 = vmax.f32 %v2382_v35, 0.0 }
 0x3a8   : > { %p3514_p2 = pneg %p3513_p0 }
 0x3aa   : > { %v2350_v52 = vpop.f32.mrf.mxu3  ;;  %p3519_p8 = pnand %p3518_p7, %p3514_p2 }
 0x3ab   : > { %v2351_v49 = vadd.f32 %v4548_v46, %v2350_v52 }
 0x3ad   : > { %v2383_v39 = vadd.f32 %v3131_v4, %v2351_v49 }
 0x3af   : > { %v2399_v36 = vmax.f32 %v2383_v39, 0.0 }
 0x3b1   : > { %v3165_v63 = vpack.c.bf16 %v2399_v36, %v2398_v7 }
 0x3b2   : > { %v2353_v25 = vpop.f32.mrf.mxu3 }
 0x3b3   : > { %3201 = vst [vmem:[%s4564_s13 + $0x10] sm:$0xff] %v3165_v63   ;;  %v2354_v11 = vadd.f32 %v4548_v46, %v2353_v25 }
 0x3b5   : > { %v2384_v48 = vadd.f32 %v3134_v12, %v2354_v11 }
 0x3b7   : > { %v2400_v22 = vmax.f32 %v2384_v48, 0.0 }
 0x3ba   : > { %v2355_v15 = vpop.f32.mrf.mxu3 }
 0x3bb   : > { %v2356_v1 = vadd.f32 %v4548_v46, %v2355_v15 }
 0x3bd   : > { %v2385_v0 = vadd.f32 %v3135_v33, %v2356_v1 }
 0x3bf   : > { %v2401_v43 = vmax.f32 %v2385_v0, 0.0 }
 0x3c1   : > { %v3170_v34 = vpack.c.bf16 %v2401_v43, %v2400_v22 }
 0x3c2   : > { %v2358_v61 = vpop.f32.mrf.mxu3 }
 0x3c3   : > { %3202 = vst [vmem:[%s4564_s13 + $0x18] sm:$0xff] %v3170_v34   ;;  %v2359_v13 = vadd.f32 %v4548_v46, %v2358_v61 }
 0x3c5   : > { %v2386_v9 = vadd.f32 %v3138_v32, %v2359_v13 }
 0x3c7   : > { %v2402_v57 = vmax.f32 %v2386_v9, 0.0 }
 0x3ca   : > { %v2360_v23 = vpop.f32.mrf.mxu3 }
 0x3cb   : > { %v2361_v10 = vadd.f32 %v4548_v46, %v2360_v23 }
 0x3cd   : > { %v2387_v29 = vadd.f32 %v3139_v40, %v2361_v10 }
 0x3cf   : > { %v2403_v5 = vmax.f32 %v2387_v29, 0.0 }
 0x3d1   : > { %v3175_v50 = vpack.c.bf16 %v2403_v5, %v2402_v57 }
 0x3d2   : > { %v2363_v2 = vpop.f32.mrf.mxu3 }
 0x3d3   : > { %3203 = vst [vmem:[%s4564_s13 + $0x20] sm:$0xff] %v3175_v50   ;;  %v2364_v62 = vadd.f32 %v4548_v46, %v2363_v2 }
 0x3d5   : > { %v2388_v20 = vadd.f32 %v3142_v56, %v2364_v62 }
 0x3d7   : > { %v2404_v42 = vmax.f32 %v2388_v20, 0.0 }
 0x3da   : > { %v2365_v31 = vpop.f32.mrf.mxu3 }
 0x3db   : > { %v2366_v16 = vadd.f32 %v4548_v46, %v2365_v31 }
 0x3dd   : > { %v2389_v26 = vadd.f32 %v3143_v19, %v2366_v16 }
 0x3df   : > { %v2405_v3 = vmax.f32 %v2389_v26, 0.0 }
 0x3e1   : > { %v3180_v47 = vpack.c.bf16 %v2405_v3, %v2404_v42 }
 0x3e2   : > { %v2368_v37 = vpop.f32.mrf.mxu3 }
 0x3e3   : > { %3204 = vst [vmem:[%s4564_s13 + $0x28] sm:$0xff] %v3180_v47   ;;  %v2369_v54 = vadd.f32 %v4548_v46, %v2368_v37 }
 0x3e5   : > { %v2390_v30 = vadd.f32 %v3146_v14, %v2369_v54 }
 0x3e7   : > { %v2406_v17 = vmax.f32 %v2390_v30, 0.0 }
 0x3ea   : > { %v2370_v8 = vpop.f32.mrf.mxu3 }
 0x3eb   : > { %v2371_v28 = vadd.f32 %v4548_v46, %v2370_v8 }
 0x3ed   : > { %v2391_v24 = vadd.f32 %v3147_v60, %v2371_v28 }
 0x3ef   : > { %v2407_v21 = vmax.f32 %v2391_v24, 0.0 }
 0x3f1   : > { %v3185_v44 = vpack.c.bf16 %v2407_v21, %v2406_v17 }
 0x3f2   : > { %v2373_v41 = vpop.f32.mrf.mxu3 }
 0x3f3   : > { %3205 = vst [vmem:[%s4564_s13 + $0x30] sm:$0xff] %v3185_v44   ;;  %v2374_v59 = vadd.f32 %v4548_v46, %v2373_v41 }
 0x3f5   : > { %v2392_v38 = vadd.f32 %v3150_v6, %v2374_v59 }
 0x3f7   : > { %v2408_v35 = vmax.f32 %v2392_v38, 0.0 }
 0x3fa   : > { %v2375_v51 = vpop.f32.mrf.mxu3 }
 0x3fb   : > { %v2376_v4 = vadd.f32 %v4548_v46, %v2375_v51 }
 0x3fd   : > { %v2393_v52 = vadd.f32 %v3151_v18, %v2376_v4 }
 0x3ff   : > { %v2409_v49 = vmax.f32 %v2393_v52, 0.0 }
 0x401   : > { %v3190_v39 = vpack.c.bf16 %v2409_v49, %v2408_v35 }
 0x403   : > { %3206 = vst [vmem:[%s4564_s13 + $0x38] sm:$0xff] %v3190_v39  }
 0x404   : > { %3522 = shalt.err (!%p3519_p8)
}
 0x405   : > { %s3633_s27 = smov 64   ;;  %s3634_s19 = smov 4  }
 0x406   : > { %3248 = dma.vmem_to_hbm [thread:$0]  (%p3745_p6), %s2459_s16, 1024, %s2461_s8, %s2443_s18, %s3633_s27, %s3633_s27, %s3634_s19  }
 0x407 PF: > { %s4786_s13 = sld [smem:[#allocation15_spill]]  ;;  %p3275_p9 = scmp.ge.s32.totalorder %s3625_s11, 2 }
 0x409   : > { %p3265_p12 = pnand %p3275_p9, %p3751_p10 }
 0x40b   : > { %p3266_p13 = pneg %p3265_p12 }
 0x40d   : > { %s2475_s17 = sand.u32 1, %s4786_s13  }
 0x40e   : > { %s2476_s7 = scalar_lea.sflag [#allocation4], %s2475_s17 }
 0x40f   : > { %3580 = dma.done.wait (%p3266_p13), %s2476_s7, 1024  }
 0x410   : > { %3582 = vsyncadd (%p3266_p13), %s2476_s7, 4294966272  ;;  %s25_s11 = sadd.s32 1, %s3625_s11   ;;  %s4788_s24 = sld [smem:[#allocation16_spill]] }
 0x411   : > { %p22_p1 = scmp.ge.s32.totalorder %s25_s11, 6   ;;  %s4789_s30 = sld [smem:[#allocation18_spill]] }
 0x412   : > { %s4790_s8 = sld [smem:[#allocation19_spill]]  ;;  %s4793_s25 = smov %s3593_s26 }
 0x413   : > { %s4791_s9 = sld [smem:[#allocation22_spill]]  ;;  %s4794_s26 = smov %s3818_s5 }
 0x414   : > { %s4792_s10 = sld [smem:[#allocation23_spill]]  ;;  %s4795_s27 = smov %s3601_s28 }
 0x415   : > { %s4796_s28 = smov %s3605_s29  ;;  %s4797_s29 = smov %s3815_s1 }
 0x416   :  { %24 = sbr.rel (!%p22_p1) target bundleno = 16 (0x10), region = 109 }
 0x41b   :  { %2482 = vsyncpa [#allocation3], 1 }
 0x41c   :  { %2484 = vsyncpa [#allocation3 + $0x1], 1 }
 0x41d   :  { %2485 = vsyncpa [#allocation6], 1 }
 0x41e   :  { %2486 = vsyncpa [#allocation9], 1 }
 0x41f   :  { %2487 = vsyncpa [#allocation4], 1 }
 0x420   :  { %2489 = vsyncpa [#allocation4 + $0x1], 1 }

</bundles_post_ra>
